<compile_context>
chip_gen: v7x
topology: tpu7x:2x2x1
jax: 0.10.0
libtpu: 0.0.40
codegen_flags: <defaults>
</compile_context>

<pallas_src>
import functools

import jax
import jax.numpy as jnp
from jax.experimental import pallas as pl
from jax.experimental.pallas import tpu as pltpu

EPS = 1e-5                 # PyTorch nn.LayerNorm default
_VMEM_LIMIT = 32 * 1024 * 1024  # safe on v5e/v6e (128 MiB) and v7x (64 MiB)
_CDIMS = (((1,), (1,)), ((), ()))  # contract last dims of both operands (x @ w.T, no relayout)


def _round_up(n, m):
    return ((n + m - 1) // m) * m


def _layernorm(x, gamma, beta):
    # single pass: sum and sum-of-squares (both reductions independent), f32 stats
    d = x.shape[-1]
    mu = jnp.sum(x, axis=-1, keepdims=True) * (1.0 / d)
    ms = jnp.sum(x * x, axis=-1, keepdims=True) * (1.0 / d)
    var = jnp.maximum(ms - mu * mu, 0.0)
    return (x - mu) * jax.lax.rsqrt(var + EPS) * gamma + beta


def _gelu(x):
    # exact (erf-based) GELU, matching torch.nn.GELU() default
    return x * 0.5 * (1.0 + jax.lax.erf(x * 0.7071067811865476))


# ---------------------------------------------------------------------------
# Kernel 1: plain linear (optionally fused GELU / tanh), row-tiled over N.
# ---------------------------------------------------------------------------
def _linear_kernel(x_ref, w_ref, b_ref, o_ref, *, activation):
    xb = x_ref[...].astype(jnp.bfloat16)
    y = jax.lax.dot_general(xb, w_ref[...], _CDIMS,
                            preferred_element_type=jnp.float32) + b_ref[...]
    if activation == "gelu":
        y = _gelu(y)
    elif activation == "tanh":
        y = jnp.tanh(y)
    o_ref[...] = y.astype(o_ref.dtype)


def linear(x2d, w, b, activation="none", row_tile=512):
    # w: [Dout, Din] (PyTorch layout), b: [Dout]
    N, Din = x2d.shape
    Dout = w.shape[0]
    # lane-dense output: pad Dout to a multiple of 128 (unmasked stores)
    Dout_p = _round_up(Dout, 128)
    if Dout_p != Dout:
        w = jnp.pad(w, ((0, Dout_p - Dout), (0, 0)))
        b = jnp.pad(b, (0, Dout_p - Dout))
    # row tile (multiple of 8) and row padding so the grid divides evenly
    tn = min(_round_up(N, 8), row_tile)
    N_p = _round_up(N, tn)
    if N_p != N:
        x2d = jnp.pad(x2d, ((0, N_p - N), (0, 0)))

    cost = pl.CostEstimate(
        flops=2 * N_p * Din * Dout_p,
        transcendentals=N_p * Dout_p if activation != "none" else 0,
        bytes_accessed=N_p * Din * 4 + Dout_p * Din * 2 + N_p * Dout_p * 4,
    )
    out = pl.pallas_call(
        functools.partial(_linear_kernel, activation=activation),
        out_shape=jax.ShapeDtypeStruct((N_p, Dout_p), x2d.dtype),
        grid=(N_p // tn,),
        in_specs=[
            pl.BlockSpec((tn, Din), lambda i: (i, 0)),
            pl.BlockSpec((Dout_p, Din), lambda i: (0, 0)),
            pl.BlockSpec((1, Dout_p), lambda i: (0, 0)),
        ],
        out_specs=pl.BlockSpec((tn, Dout_p), lambda i: (i, 0)),
        compiler_params=pltpu.CompilerParams(
            dimension_semantics=("parallel",),
            vmem_limit_bytes=_VMEM_LIMIT),
        cost_estimate=cost,
    )(x2d, w.astype(jnp.bfloat16), b.reshape(1, Dout_p).astype(jnp.float32))
    return out[:N, :Dout]


# ---------------------------------------------------------------------------
# Kernel 2: LayerNorm + linear (+ tanh), row-tiled.  Decoder "gate" head.
# ---------------------------------------------------------------------------
def _ln_linear_kernel(x_ref, g_ref, be_ref, w_ref, b_ref, o_ref, *, activation):
    x = _layernorm(x_ref[...], g_ref[...], be_ref[...])
    y = jax.lax.dot_general(x.astype(jnp.bfloat16), w_ref[...], _CDIMS,
                            preferred_element_type=jnp.float32) + b_ref[...]
    if activation == "tanh":
        y = jnp.tanh(y)
    o_ref[...] = y.astype(o_ref.dtype)


def ln_linear(x2d, gamma, beta, w, b, activation="none", row_tile=512):
    N, Din = x2d.shape
    Dout = w.shape[0]
    Dout_p = _round_up(Dout, 128)
    if Dout_p != Dout:
        w = jnp.pad(w, ((0, Dout_p - Dout), (0, 0)))
        b = jnp.pad(b, (0, Dout_p - Dout))
    tn = min(_round_up(N, 8), row_tile)
    N_p = _round_up(N, tn)
    if N_p != N:
        x2d = jnp.pad(x2d, ((0, N_p - N), (0, 0)))

    cost = pl.CostEstimate(
        flops=2 * N_p * Din * Dout_p + 8 * N_p * Din,
        transcendentals=N_p * Dout_p if activation == "tanh" else 0,
        bytes_accessed=N_p * Din * 4 + Dout_p * Din * 2 + N_p * Dout_p * 4,
    )
    out = pl.pallas_call(
        functools.partial(_ln_linear_kernel, activation=activation),
        out_shape=jax.ShapeDtypeStruct((N_p, Dout_p), x2d.dtype),
        grid=(N_p // tn,),
        in_specs=[
            pl.BlockSpec((tn, Din), lambda i: (i, 0)),
            pl.BlockSpec((1, Din), lambda i: (0, 0)),
            pl.BlockSpec((1, Din), lambda i: (0, 0)),
            pl.BlockSpec((Dout_p, Din), lambda i: (0, 0)),
            pl.BlockSpec((1, Dout_p), lambda i: (0, 0)),
        ],
        out_specs=pl.BlockSpec((tn, Dout_p), lambda i: (i, 0)),
        compiler_params=pltpu.CompilerParams(
            dimension_semantics=("parallel",),
            vmem_limit_bytes=_VMEM_LIMIT),
        cost_estimate=cost,
    )(x2d, gamma.reshape(1, Din), beta.reshape(1, Din),
      w.astype(jnp.bfloat16), b.reshape(1, Dout_p).astype(jnp.float32))
    return out[:N, :Dout]


# ---------------------------------------------------------------------------
# Kernel 3: fused Residual(PostNorm(gMLPBlock)) — `bb` batch elements per step.
#   y = LayerNorm_post( proj_out( SGU( GELU(proj_in(x)) ) ) ) + x
#   SGU: split -> LayerNorm(gate) -> seq-mixing matmul (Conv1d k=1) -> gate*res
# proj_in weight is pre-split into res/gate halves so both halves are
# lane-aligned (no mid-lane slicing).
# ---------------------------------------------------------------------------
def _gmlp_block_kernel(x_ref, wir_ref, bir_ref, wig_ref, big_ref,
                       sg_ref, sb_ref, wseq_ref, bseq_ref,
                       wo_ref, bo_ref, png_ref, pnb_ref, o_ref):
    bb, T, D = x_ref.shape
    x = x_ref[...].reshape(bb * T, D)            # layout-free (bb==1 or T % 8 == 0)
    xb = x.astype(jnp.bfloat16)

    # proj_in (res / gate halves) + exact-erf GELU; bf16 in, f32 accumulate
    res = _gelu(jax.lax.dot_general(xb, wir_ref[...], _CDIMS,
                                    preferred_element_type=jnp.float32) + bir_ref[...])
    gate = _gelu(jax.lax.dot_general(xb, wig_ref[...], _CDIMS,
                                     preferred_element_type=jnp.float32) + big_ref[...])

    # SGU: LayerNorm(gate) -> per-b seq-mixing matmul (Conv1d k=1) -> gate * res
    gate = _layernorm(gate, sg_ref[...], sb_ref[...])
    wseq = wseq_ref[...]                          # [T, T] bf16
    bseq = bseq_ref[...]                          # [T, 1] f32
    parts = []
    for bi in range(bb):                          # bb static & small -> unrolled
        g = gate[bi * T:(bi + 1) * T, :].astype(jnp.bfloat16)
        m = jnp.dot(wseq, g, preferred_element_type=jnp.float32) + bseq
        parts.append(m * res[bi * T:(bi + 1) * T, :])
    y = parts[0] if bb == 1 else jnp.concatenate(parts, axis=0)

    # proj_out
    y = jax.lax.dot_general(y.astype(jnp.bfloat16), wo_ref[...], _CDIMS,
                            preferred_element_type=jnp.float32) + bo_ref[...]
    # PostNorm + residual (residual stream stays f32)
    y = _layernorm(y, png_ref[...], pnb_ref[...]) + x
    o_ref[...] = y.reshape(bb, T, D).astype(o_ref.dtype)


def gmlp_block(x, p):
    B, T, D = x.shape
    Dff = p["wi"].shape[0]
    half = Dff // 2

    # batch-block: fill the MXU M dimension when T is small. Only batch when T
    # is sublane aligned so the in-kernel (bb,T,D)->(bb*T,D) reshape is free.
    bb = 1
    if T % 8 == 0:
        for cand in range(min(B, max(1, 256 // T)), 0, -1):
            if B % cand == 0:
                bb = cand
                break

    wi_res = p["wi"][:half].astype(jnp.bfloat16)
    wi_gate = p["wi"][half:].astype(jnp.bfloat16)
    bi_res = p["bi"][:half].reshape(1, half)
    bi_gate = p["bi"][half:].reshape(1, half)

    cost = pl.CostEstimate(
        flops=2 * B * T * (D * Dff + T * half + half * D),
        transcendentals=B * T * Dff,
        bytes_accessed=2 * B * T * D * 4 + (Dff * D + T * T + D * half) * 2,
    )

    return pl.pallas_call(
        _gmlp_block_kernel,
        out_shape=jax.ShapeDtypeStruct((B, T, D), x.dtype),
        grid=(B // bb,),
        in_specs=[
            pl.BlockSpec((bb, T, D), lambda b: (b, 0, 0)),
            pl.BlockSpec((half, D), lambda b: (0, 0)),   # wi_res   (bf16)
            pl.BlockSpec((1, half), lambda b: (0, 0)),   # bi_res
            pl.BlockSpec((half, D), lambda b: (0, 0)),   # wi_gate  (bf16)
            pl.BlockSpec((1, half), lambda b: (0, 0)),   # bi_gate
            pl.BlockSpec((1, half), lambda b: (0, 0)),   # sgu ln gamma
            pl.BlockSpec((1, half), lambda b: (0, 0)),   # sgu ln beta
            pl.BlockSpec((T, T), lambda b: (0, 0)),      # wseq     (bf16)
            pl.BlockSpec((T, 1), lambda b: (0, 0)),      # bseq
            pl.BlockSpec((D, half), lambda b: (0, 0)),   # wo       (bf16)
            pl.BlockSpec((1, D), lambda b: (0, 0)),      # bo
            pl.BlockSpec((1, D), lambda b: (0, 0)),      # postnorm gamma
            pl.BlockSpec((1, D), lambda b: (0, 0)),      # postnorm beta
        ],
        out_specs=pl.BlockSpec((bb, T, D), lambda b: (b, 0, 0)),
        compiler_params=pltpu.CompilerParams(
            dimension_semantics=("parallel",),
            vmem_limit_bytes=_VMEM_LIMIT),
        cost_estimate=cost,
    )(
        x,
        wi_res, bi_res, wi_gate, bi_gate,
        p["sgu_g"].reshape(1, half), p["sgu_b"].reshape(1, half),
        p["wseq"].astype(jnp.bfloat16), p["bseq"].reshape(T, 1),
        p["wo"].astype(jnp.bfloat16), p["bo"].reshape(1, D),
        p["pn_g"].reshape(1, D), p["pn_b"].reshape(1, D),
    )


# ---------------------------------------------------------------------------
# Parameter init (deterministic, synthetic; f32 master weights)
# ---------------------------------------------------------------------------
def _init_block(key, dim, dim_ff, T):
    half = dim_ff // 2
    ks = jax.random.split(key, 6)
    init_eps = 1e-3 / T  # mirrors SpatialGatingUnit init
    return dict(
        wi=jax.random.normal(ks[0], (dim_ff, dim), jnp.float32) * 0.02,
        bi=jax.random.normal(ks[1], (dim_ff,), jnp.float32) * 0.02,
        sgu_g=jnp.ones((half,), jnp.float32),
        sgu_b=jnp.zeros((half,), jnp.float32),
        wseq=jax.random.uniform(ks[2], (T, T), jnp.float32, -init_eps, init_eps),
        bseq=jnp.ones((T,), jnp.float32),
        wo=jax.random.normal(ks[3], (dim, half), jnp.float32) * 0.02,
        bo=jax.random.normal(ks[4], (dim,), jnp.float32) * 0.02,
        pn_g=jnp.ones((dim,), jnp.float32),
        pn_b=jnp.zeros((dim,), jnp.float32),
    )


def init_params(key, *, patch_dim, num_patches, dim, embed_dim,
                enc_depth, dec_depth, ff_mult):
    dim_ff = ff_mult * dim
    keys = jax.random.split(key, 8 + enc_depth + dec_depth)
    it = iter(keys)
    params = dict(
        enc_embed_w=jax.random.normal(next(it), (dim, patch_dim), jnp.float32) * 0.02,
        enc_embed_b=jax.random.normal(next(it), (dim,), jnp.float32) * 0.02,
        bottleneck_w=jax.random.normal(next(it), (embed_dim, dim), jnp.float32) * 0.02,
        bottleneck_b=jax.random.normal(next(it), (embed_dim,), jnp.float32) * 0.02,
        dec_proj_w=jax.random.normal(next(it), (dim, embed_dim), jnp.float32) * 0.02,
        dec_proj_b=jax.random.normal(next(it), (dim,), jnp.float32) * 0.02,
        gate_g=jnp.ones((dim,), jnp.float32),
        gate_b=jnp.zeros((dim,), jnp.float32),
        gate_w=jax.random.normal(next(it), (patch_dim, dim), jnp.float32) * 0.02,
        gate_bias=jax.random.normal(next(it), (patch_dim,), jnp.float32) * 0.02,
        enc_blocks=[_init_block(next(it), dim, dim_ff, num_patches) for _ in range(enc_depth)],
        dec_blocks=[_init_block(next(it), dim, dim_ff, num_patches) for _ in range(dec_depth)],
    )
    return params


# ---------------------------------------------------------------------------
# Full forward (eval mode: no layer-drop, no dropout)
# ---------------------------------------------------------------------------
def audio_mae_forward(x, params, *, patch_f, patch_t):
    B, F, Tspec = x.shape
    f, t = F // patch_f, Tspec // patch_t
    T = f * t                      # num_patches
    P = patch_f * patch_t          # patch dim
    dim = params["enc_embed_w"].shape[0]
    e = params["bottleneck_w"].shape[0]

    # Rearrange 'b (f p1) (t p2) -> b (f t) (p1 p2)'  (glue)
    xp = x.reshape(B, f, patch_f, t, patch_t).transpose(0, 1, 3, 2, 4).reshape(B, T, P)

    # -------- encoder --------
    h = linear(xp.reshape(B * T, P), params["enc_embed_w"], params["enc_embed_b"]).reshape(B, T, dim)
    for bp in params["enc_blocks"]:
        h = gmlp_block(h, bp)
    z = linear(h.reshape(B * T, dim), params["bottleneck_w"], params["bottleneck_b"],
               activation="gelu").reshape(B, T, e)
    # TODO(synk): embed_drop (nn.Dropout) and layer-drop are identity in eval mode and are omitted.

    # -------- decoder --------
    h = linear(z.reshape(B * T, e), params["dec_proj_w"], params["dec_proj_b"]).reshape(B, T, dim)
    for bp in params["dec_blocks"]:
        h = gmlp_block(h, bp)
    # gate head: LayerNorm + Linear(dim, P) + tanh  (tanh commutes with transpose)
    y = ln_linear(h.reshape(B * T, dim), params["gate_g"], params["gate_b"],
                  params["gate_w"], params["gate_bias"], activation="tanh").reshape(B, T, P)
    # Rearrange 'b t f -> b f t'
    return jnp.transpose(y, (0, 2, 1))


if __name__ == "__main__":
    # small config consistent with the module's constructor semantics
    B = 2
    spec_f, spec_t = 16, 8          # input_res
    patch_f, patch_t = 16, 1        # patch_res  -> num_patches = 8, patch_dim = 16
    dim, embed_dim, ff_mult = 32, 8, 4
    enc_depth = dec_depth = 2

    num_patches = (spec_f // patch_f) * (spec_t // patch_t)
    patch_dim = patch_f * patch_t

    key = jax.random.PRNGKey(0)
    kx, kp = jax.random.split(key)
    x = jax.random.normal(kx, (B, spec_f, spec_t), jnp.float32)
    params = init_params(kp, patch_dim=patch_dim, num_patches=num_patches,
                         dim=dim, embed_dim=embed_dim,
                         enc_depth=enc_depth, dec_depth=dec_depth, ff_mult=ff_mult)

    fwd = jax.jit(functools.partial(audio_mae_forward, patch_f=patch_f, patch_t=patch_t))
    y = fwd(x, params)
    jax.block_until_ready(y)

    assert y.shape == (B, patch_dim, num_patches), y.shape
    assert bool(jnp.all(jnp.isfinite(y)))
    print("KERNEL_OK")
</pallas_src>

<mosaic_0001>
module attributes {stable_mosaic.version = 11 : i64} {
  func.func @_linear_kernel(%arg0: i32, %arg1: memref<16x16xf32, #tpu.memory_space<vmem>>, %arg2: memref<128x16xbf16, #tpu.memory_space<vmem>>, %arg3: memref<1x128xf32, #tpu.memory_space<vmem>>, %arg4: memref<16x128xf32, #tpu.memory_space<vmem>>) attributes {dimension_semantics = [#tpu.dimension_semantics<parallel>], iteration_bounds = array<i64: 1>, scalar_prefetch = 0 : i64, scratch_operands = 0 : i64, tpu.core_type = #tpu.core_type<tc>, window_params = [{transform_indices = @transform_0, window_bounds = array<i64: 16, 16>}, {pipeline_mode = #tpu.pipeline_mode<synchronous>, transform_indices = @transform_1, window_bounds = array<i64: 128, 16>}, {pipeline_mode = #tpu.pipeline_mode<synchronous>, transform_indices = @transform_2, window_bounds = array<i64: 1, 128>}, {transform_indices = @transform_3, window_bounds = array<i64: 16, 128>}]} {
    %c0 = arith.constant 0 : index
    %c0_0 = arith.constant 0 : index
    %0 = vector.load %arg1[%c0, %c0_0] : memref<16x16xf32, #tpu.memory_space<vmem>>, vector<16x16xf32>
    %1 = arith.truncf %0 : vector<16x16xf32> to vector<16x16xbf16>
    %c0_1 = arith.constant 0 : index
    %c0_2 = arith.constant 0 : index
    %2 = vector.load %arg2[%c0_1, %c0_2] : memref<128x16xbf16, #tpu.memory_space<vmem>>, vector<128x16xbf16>
    %cst = arith.constant dense<0.000000e+00> : vector<16x128xf32>
    %3 = tpu.matmul %1, %2, %cst {dimension_numbers = #tpu.dot_dimension_numbers<[1], [1], [0], [0], [0, 0, 1, 0], [], []>} : vector<16x16xbf16>, vector<128x16xbf16>, vector<16x128xf32> -> vector<16x128xf32>
    %c0_3 = arith.constant 0 : index
    %c0_4 = arith.constant 0 : index
    %4 = vector.load %arg3[%c0_3, %c0_4] : memref<1x128xf32, #tpu.memory_space<vmem>>, vector<1x128xf32>
    %5 = vector.broadcast %4 : vector<1x128xf32> to vector<16x128xf32>
    %6 = arith.addf %3, %5 : vector<16x128xf32>
    %c0_5 = arith.constant 0 : index
    %c0_6 = arith.constant 0 : index
    %7 = vector.load %arg4[%c0_5, %c0_6] : memref<16x128xf32, #tpu.memory_space<vmem>>, vector<16x128xf32>
    tpu.vector_store %arg4[%c0_5, %c0_6], %6 {strides = array<i32>} : memref<16x128xf32, #tpu.memory_space<vmem>>, vector<16x128xf32>,
    return
  }
  func.func @transform_0(%arg0: i32) -> (i32, i32) {
    %c0_i32 = arith.constant 0 : i32
    %c0_i32_0 = arith.constant 0 : i32
    return %arg0, %c0_i32 : i32, i32
  }
  func.func @transform_1(%arg0: i32) -> (i32, i32) {
    %c0_i32 = arith.constant 0 : i32
    %c0_i32_0 = arith.constant 0 : i32
    %c0_i32_1 = arith.constant 0 : i32
    return %c0_i32, %c0_i32_0 : i32, i32
  }
  func.func @transform_2(%arg0: i32) -> (i32, i32) {
    %c0_i32 = arith.constant 0 : i32
    %c0_i32_0 = arith.constant 0 : i32
    %c0_i32_1 = arith.constant 0 : i32
    return %c0_i32, %c0_i32_0 : i32, i32
  }
  func.func @transform_3(%arg0: i32) -> (i32, i32) {
    %c0_i32 = arith.constant 0 : i32
    %c0_i32_0 = arith.constant 0 : i32
    return %arg0, %c0_i32 : i32, i32
  }
}

module attributes {stable_mosaic.version = 11 : i64} {
  func.func @_linear_kernel(%arg0: i32, %arg1: memref<16x32xf32, #tpu.memory_space<vmem>>, %arg2: memref<128x32xbf16, #tpu.memory_space<vmem>>, %arg3: memref<1x128xf32, #tpu.memory_space<vmem>>, %arg4: memref<16x128xf32, #tpu.memory_space<vmem>>) attributes {dimension_semantics = [#tpu.dimension_semantics<parallel>], iteration_bounds = array<i64: 1>, scalar_prefetch = 0 : i64, scratch_operands = 0 : i64, tpu.core_type = #tpu.core_type<tc>, window_params = [{transform_indices = @transform_0, window_bounds = array<i64: 16, 32>}, {pipeline_mode = #tpu.pipeline_mode<synchronous>, transform_indices = @transform_1, window_bounds = array<i64: 128, 32>}, {pipeline_mode = #tpu.pipeline_mode<synchronous>, transform_indices = @transform_2, window_bounds = array<i64: 1, 128>}, {transform_indices = @transform_3, window_bounds = array<i64: 16, 128>}]} {
    %c0 = arith.constant 0 : index
    %c0_0 = arith.constant 0 : index
    %0 = vector.load %arg1[%c0, %c0_0] : memref<16x32xf32, #tpu.memory_space<vmem>>, vector<16x32xf32>
    %1 = arith.truncf %0 : vector<16x32xf32> to vector<16x32xbf16>
    %c0_1 = arith.constant 0 : index
    %c0_2 = arith.constant 0 : index
    %2 = vector.load %arg2[%c0_1, %c0_2] : memref<128x32xbf16, #tpu.memory_space<vmem>>, vector<128x32xbf16>
    %cst = arith.constant dense<0.000000e+00> : vector<16x128xf32>
    %3 = tpu.matmul %1, %2, %cst {dimension_numbers = #tpu.dot_dimension_numbers<[1], [1], [0], [0], [0, 0, 1, 0], [], []>} : vector<16x32xbf16>, vector<128x32xbf16>, vector<16x128xf32> -> vector<16x128xf32>
    %c0_3 = arith.constant 0 : index
    %c0_4 = arith.constant 0 : index
    %4 = vector.load %arg3[%c0_3, %c0_4] : memref<1x128xf32, #tpu.memory_space<vmem>>, vector<1x128xf32>
    %5 = vector.broadcast %4 : vector<1x128xf32> to vector<16x128xf32>
    %6 = arith.addf %3, %5 : vector<16x128xf32>
    %cst_5 = arith.constant 5.000000e-01 : f32
    %7 = vector.broadcast %cst_5 : f32 to vector<16x128xf32>
    %8 = arith.mulf %6, %7 : vector<16x128xf32>
    %cst_6 = arith.constant 0.707106769 : f32
    %9 = vector.broadcast %cst_6 : f32 to vector<16x128xf32>
    %10 = arith.mulf %6, %9 : vector<16x128xf32>
    %11 = math.erf %10 : vector<16x128xf32>
    %cst_7 = arith.constant 1.000000e+00 : f32
    %12 = vector.broadcast %cst_7 : f32 to vector<16x128xf32>
    %13 = arith.addf %12, %11 : vector<16x128xf32>
    %14 = arith.mulf %8, %13 : vector<16x128xf32>
    %c0_8 = arith.constant 0 : index
    %c0_9 = arith.constant 0 : index
    %15 = vector.load %arg4[%c0_8, %c0_9] : memref<16x128xf32, #tpu.memory_space<vmem>>, vector<16x128xf32>
    tpu.vector_store %arg4[%c0_8, %c0_9], %14 {strides = array<i32>} : memref<16x128xf32, #tpu.memory_space<vmem>>, vector<16x128xf32>,
    return
  }
  func.func @transform_0(%arg0: i32) -> (i32, i32) {
    %c0_i32 = arith.constant 0 : i32
    %c0_i32_0 = arith.constant 0 : i32
    return %arg0, %c0_i32 : i32, i32
  }
  func.func @transform_1(%arg0: i32) -> (i32, i32) {
    %c0_i32 = arith.constant 0 : i32
    %c0_i32_0 = arith.constant 0 : i32
    %c0_i32_1 = arith.constant 0 : i32
    return %c0_i32, %c0_i32_0 : i32, i32
  }
  func.func @transform_2(%arg0: i32) -> (i32, i32) {
    %c0_i32 = arith.constant 0 : i32
    %c0_i32_0 = arith.constant 0 : i32
    %c0_i32_1 = arith.constant 0 : i32
    return %c0_i32, %c0_i32_0 : i32, i32
  }
  func.func @transform_3(%arg0: i32) -> (i32, i32) {
    %c0_i32 = arith.constant 0 : i32
    %c0_i32_0 = arith.constant 0 : i32
    return %arg0, %c0_i32 : i32, i32
  }
}

module attributes {stable_mosaic.version = 11 : i64} {
  func.func @_gmlp_block_kernel(%arg0: i32, %arg1: memref<2x8x32xf32, #tpu.memory_space<vmem>>, %arg2: memref<64x32xbf16, #tpu.memory_space<vmem>>, %arg3: memref<1x64xf32, #tpu.memory_space<vmem>>, %arg4: memref<64x32xbf16, #tpu.memory_space<vmem>>, %arg5: memref<1x64xf32, #tpu.memory_space<vmem>>, %arg6: memref<1x64xf32, #tpu.memory_space<vmem>>, %arg7: memref<1x64xf32, #tpu.memory_space<vmem>>, %arg8: memref<8x8xbf16, #tpu.memory_space<vmem>>, %arg9: memref<8x1xf32, #tpu.memory_space<vmem>>, %arg10: memref<32x64xbf16, #tpu.memory_space<vmem>>, %arg11: memref<1x32xf32, #tpu.memory_space<vmem>>, %arg12: memref<1x32xf32, #tpu.memory_space<vmem>>, %arg13: memref<1x32xf32, #tpu.memory_space<vmem>>, %arg14: memref<2x8x32xf32, #tpu.memory_space<vmem>>) attributes {dimension_semantics = [#tpu.dimension_semantics<parallel>], iteration_bounds = array<i64: 1>, scalar_prefetch = 0 : i64, scratch_operands = 0 : i64, tpu.core_type = #tpu.core_type<tc>, window_params = [{transform_indices = @transform_0, window_bounds = array<i64: 2, 8, 32>}, {pipeline_mode = #tpu.pipeline_mode<synchronous>, transform_indices = @transform_1, window_bounds = array<i64: 64, 32>}, {pipeline_mode = #tpu.pipeline_mode<synchronous>, transform_indices = @transform_2, window_bounds = array<i64: 1, 64>}, {pipeline_mode = #tpu.pipeline_mode<synchronous>, transform_indices = @transform_3, window_bounds = array<i64: 64, 32>}, {pipeline_mode = #tpu.pipeline_mode<synchronous>, transform_indices = @transform_4, window_bounds = array<i64: 1, 64>}, {pipeline_mode = #tpu.pipeline_mode<synchronous>, transform_indices = @transform_5, window_bounds = array<i64: 1, 64>}, {pipeline_mode = #tpu.pipeline_mode<synchronous>, transform_indices = @transform_6, window_bounds = array<i64: 1, 64>}, {pipeline_mode = #tpu.pipeline_mode<synchronous>, transform_indices = @transform_7, window_bounds = array<i64: 8, 8>}, {pipeline_mode = #tpu.pipeline_mode<synchronous>, transform_indices = @transform_8, window_bounds = array<i64: 8, 1>}, {pipeline_mode = #tpu.pipeline_mode<synchronous>, transform_indices = @transform_9, window_bounds = array<i64: 32, 64>}, {pipeline_mode = #tpu.pipeline_mode<synchronous>, transform_indices = @transform_10, window_bounds = array<i64: 1, 32>}, {pipeline_mode = #tpu.pipeline_mode<synchronous>, transform_indices = @transform_11, window_bounds = array<i64: 1, 32>}, {pipeline_mode = #tpu.pipeline_mode<synchronous>, transform_indices = @transform_12, window_bounds = array<i64: 1, 32>}, {transform_indices = @transform_13, window_bounds = array<i64: 2, 8, 32>}]} {
    %c0 = arith.constant 0 : index
    %c0_0 = arith.constant 0 : index
    %c0_1 = arith.constant 0 : index
    %0 = vector.load %arg1[%c0, %c0_0, %c0_1] : memref<2x8x32xf32, #tpu.memory_space<vmem>>, vector<2x8x32xf32>
    %1 = vector.shape_cast %0 : vector<2x8x32xf32> to vector<16x32xf32>
    %2 = arith.truncf %1 : vector<16x32xf32> to vector<16x32xbf16>
    %c0_2 = arith.constant 0 : index
    %c0_3 = arith.constant 0 : index
    %3 = vector.load %arg2[%c0_2, %c0_3] : memref<64x32xbf16, #tpu.memory_space<vmem>>, vector<64x32xbf16>
    %cst = arith.constant dense<0.000000e+00> : vector<16x64xf32>
    %4 = tpu.matmul %2, %3, %cst {dimension_numbers = #tpu.dot_dimension_numbers<[1], [1], [0], [0], [0, 0, 1, 0], [], []>} : vector<16x32xbf16>, vector<64x32xbf16>, vector<16x64xf32> -> vector<16x64xf32>
    %c0_4 = arith.constant 0 : index
    %c0_5 = arith.constant 0 : index
    %5 = vector.load %arg3[%c0_4, %c0_5] : memref<1x64xf32, #tpu.memory_space<vmem>>, vector<1x64xf32>
    %6 = vector.broadcast %5 : vector<1x64xf32> to vector<16x64xf32>
    %7 = arith.addf %4, %6 : vector<16x64xf32>
    %cst_6 = arith.constant 5.000000e-01 : f32
    %8 = vector.broadcast %cst_6 : f32 to vector<16x64xf32>
    %9 = arith.mulf %7, %8 : vector<16x64xf32>
    %cst_7 = arith.constant 0.707106769 : f32
    %10 = vector.broadcast %cst_7 : f32 to vector<16x64xf32>
    %11 = arith.mulf %7, %10 : vector<16x64xf32>
    %12 = math.erf %11 : vector<16x64xf32>
    %cst_8 = arith.constant 1.000000e+00 : f32
    %13 = vector.broadcast %cst_8 : f32 to vector<16x64xf32>
    %14 = arith.addf %13, %12 : vector<16x64xf32>
    %15 = arith.mulf %9, %14 : vector<16x64xf32>
    %c0_9 = arith.constant 0 : index
    %c0_10 = arith.constant 0 : index
    %16 = vector.load %arg4[%c0_9, %c0_10] : memref<64x32xbf16, #tpu.memory_space<vmem>>, vector<64x32xbf16>
    %cst_11 = arith.constant dense<0.000000e+00> : vector<16x64xf32>
    %17 = tpu.matmul %2, %16, %cst_11 {dimension_numbers = #tpu.dot_dimension_numbers<[1], [1], [0], [0], [0, 0, 1, 0], [], []>} : vector<16x32xbf16>, vector<64x32xbf16>, vector<16x64xf32> -> vector<16x64xf32>
    %c0_12 = arith.constant 0 : index
    %c0_13 = arith.constant 0 : index
    %18 = vector.load %arg5[%c0_12, %c0_13] : memref<1x64xf32, #tpu.memory_space<vmem>>, vector<1x64xf32>
    %19 = vector.broadcast %18 : vector<1x64xf32> to vector<16x64xf32>
    %20 = arith.addf %17, %19 : vector<16x64xf32>
    %cst_14 = arith.constant 5.000000e-01 : f32
    %21 = vector.broadcast %cst_14 : f32 to vector<16x64xf32>
    %22 = arith.mulf %20, %21 : vector<16x64xf32>
    %cst_15 = arith.constant 0.707106769 : f32
    %23 = vector.broadcast %cst_15 : f32 to vector<16x64xf32>
    %24 = arith.mulf %20, %23 : vector<16x64xf32>
    %25 = math.erf %24 : vector<16x64xf32>
    %cst_16 = arith.constant 1.000000e+00 : f32
    %26 = vector.broadcast %cst_16 : f32 to vector<16x64xf32>
    %27 = arith.addf %26, %25 : vector<16x64xf32>
    %28 = arith.mulf %22, %27 : vector<16x64xf32>
    %c0_17 = arith.constant 0 : index
    %c0_18 = arith.constant 0 : index
    %29 = vector.load %arg6[%c0_17, %c0_18] : memref<1x64xf32, #tpu.memory_space<vmem>>, vector<1x64xf32>
    %c0_19 = arith.constant 0 : index
    %c0_20 = arith.constant 0 : index
    %30 = vector.load %arg7[%c0_19, %c0_20] : memref<1x64xf32, #tpu.memory_space<vmem>>, vector<1x64xf32>
    %cst_21 = arith.constant dense<0.000000e+00> : vector<16xf32>
    %31 = vector.multi_reduction <add>, %28, %cst_21 [1] : vector<16x64xf32> to vector<16xf32>
    %32 = vector.shape_cast %31 : vector<16xf32> to vector<16x1xf32>
    %cst_22 = arith.constant 1.562500e-02 : f32
    %33 = vector.broadcast %cst_22 : f32 to vector<16x1xf32>
    %34 = arith.mulf %32, %33 : vector<16x1xf32>
    %35 = arith.mulf %28, %28 : vector<16x64xf32>
    %cst_23 = arith.constant dense<0.000000e+00> : vector<16xf32>
    %36 = vector.multi_reduction <add>, %35, %cst_23 [1] : vector<16x64xf32> to vector<16xf32>
    %37 = vector.shape_cast %36 : vector<16xf32> to vector<16x1xf32>
    %cst_24 = arith.constant 1.562500e-02 : f32
    %38 = vector.broadcast %cst_24 : f32 to vector<16x1xf32>
    %39 = arith.mulf %37, %38 : vector<16x1xf32>
    %40 = arith.mulf %34, %34 : vector<16x1xf32>
    %41 = arith.subf %39, %40 : vector<16x1xf32>
    %cst_25 = arith.constant 0.000000e+00 : f32
    %42 = vector.broadcast %cst_25 : f32 to vector<16x1xf32>
    %43 = arith.maximumf %41, %42 : vector<16x1xf32>
    %44 = vector.broadcast %34 : vector<16x1xf32> to vector<16x64xf32>
    %45 = arith.subf %28, %44 : vector<16x64xf32>
    %cst_26 = arith.constant 9.99999974E-6 : f32
    %46 = vector.broadcast %cst_26 : f32 to vector<16x1xf32>
    %47 = arith.addf %43, %46 : vector<16x1xf32>
    %48 = math.rsqrt %47 : vector<16x1xf32>
    %49 = vector.broadcast %48 : vector<16x1xf32> to vector<16x64xf32>
    %50 = arith.mulf %45, %49 : vector<16x64xf32>
    %51 = vector.broadcast %29 : vector<1x64xf32> to vector<16x64xf32>
    %52 = arith.mulf %50, %51 : vector<16x64xf32>
    %53 = vector.broadcast %30 : vector<1x64xf32> to vector<16x64xf32>
    %54 = arith.addf %52, %53 : vector<16x64xf32>
    %c0_27 = arith.constant 0 : index
    %c0_28 = arith.constant 0 : index
    %55 = vector.load %arg8[%c0_27, %c0_28] : memref<8x8xbf16, #tpu.memory_space<vmem>>, vector<8x8xbf16>
    %c0_29 = arith.constant 0 : index
    %c0_30 = arith.constant 0 : index
    %56 = vector.load %arg9[%c0_29, %c0_30] : memref<8x1xf32, #tpu.memory_space<vmem>>, vector<8x1xf32>
    %57 = vector.extract_strided_slice %54 {offsets = [0, 0], sizes = [8, 64], strides = [1, 1]} : vector<16x64xf32> to vector<8x64xf32>
    %58 = arith.truncf %57 : vector<8x64xf32> to vector<8x64xbf16>
    %cst_31 = arith.constant dense<0.000000e+00> : vector<8x64xf32>
    %59 = tpu.matmul %55, %58, %cst_31 {dimension_numbers = #tpu.dot_dimension_numbers<[1], [0], [0], [1], [0, 0, 1, 1], [], []>} : vector<8x8xbf16>, vector<8x64xbf16>, vector<8x64xf32> -> vector<8x64xf32>
    %60 = vector.broadcast %56 : vector<8x1xf32> to vector<8x64xf32>
    %61 = arith.addf %59, %60 : vector<8x64xf32>
    %62 = vector.extract_strided_slice %15 {offsets = [0, 0], sizes = [8, 64], strides = [1, 1]} : vector<16x64xf32> to vector<8x64xf32>
    %63 = arith.mulf %61, %62 : vector<8x64xf32>
    %64 = vector.extract_strided_slice %54 {offsets = [8, 0], sizes = [8, 64], strides = [1, 1]} : vector<16x64xf32> to vector<8x64xf32>
    %65 = arith.truncf %64 : vector<8x64xf32> to vector<8x64xbf16>
    %cst_32 = arith.constant dense<0.000000e+00> : vector<8x64xf32>
    %66 = tpu.matmul %55, %65, %cst_32 {dimension_numbers = #tpu.dot_dimension_numbers<[1], [0], [0], [1], [0, 0, 1, 1], [], []>} : vector<8x8xbf16>, vector<8x64xbf16>, vector<8x64xf32> -> vector<8x64xf32>
    %67 = vector.broadcast %56 : vector<8x1xf32> to vector<8x64xf32>
    %68 = arith.addf %66, %67 : vector<8x64xf32>
    %69 = vector.extract_strided_slice %15 {offsets = [8, 0], sizes = [8, 64], strides = [1, 1]} : vector<16x64xf32> to vector<8x64xf32>
    %70 = arith.mulf %68, %69 : vector<8x64xf32>
    %71 = tpu.concatenate %63, %70 in 0 : vector<8x64xf32>, vector<8x64xf32> -> vector<16x64xf32>
    %72 = arith.truncf %71 : vector<16x64xf32> to vector<16x64xbf16>
    %c0_33 = arith.constant 0 : index
    %c0_34 = arith.constant 0 : index
    %73 = vector.load %arg10[%c0_33, %c0_34] : memref<32x64xbf16, #tpu.memory_space<vmem>>, vector<32x64xbf16>
    %cst_35 = arith.constant dense<0.000000e+00> : vector<16x32xf32>
    %74 = tpu.matmul %72, %73, %cst_35 {dimension_numbers = #tpu.dot_dimension_numbers<[1], [1], [0], [0], [0, 0, 1, 0], [], []>} : vector<16x64xbf16>, vector<32x64xbf16>, vector<16x32xf32> -> vector<16x32xf32>
    %c0_36 = arith.constant 0 : index
    %c0_37 = arith.constant 0 : index
    %75 = vector.load %arg11[%c0_36, %c0_37] : memref<1x32xf32, #tpu.memory_space<vmem>>, vector<1x32xf32>
    %76 = vector.broadcast %75 : vector<1x32xf32> to vector<16x32xf32>
    %77 = arith.addf %74, %76 : vector<16x32xf32>
    %c0_38 = arith.constant 0 : index
    %c0_39 = arith.constant 0 : index
    %78 = vector.load %arg12[%c0_38, %c0_39] : memref<1x32xf32, #tpu.memory_space<vmem>>, vector<1x32xf32>
    %c0_40 = arith.constant 0 : index
    %c0_41 = arith.constant 0 : index
    %79 = vector.load %arg13[%c0_40, %c0_41] : memref<1x32xf32, #tpu.memory_space<vmem>>, vector<1x32xf32>
    %cst_42 = arith.constant dense<0.000000e+00> : vector<16xf32>
    %80 = vector.multi_reduction <add>, %77, %cst_42 [1] : vector<16x32xf32> to vector<16xf32>
    %81 = vector.shape_cast %80 : vector<16xf32> to vector<16x1xf32>
    %cst_43 = arith.constant 3.125000e-02 : f32
    %82 = vector.broadcast %cst_43 : f32 to vector<16x1xf32>
    %83 = arith.mulf %81, %82 : vector<16x1xf32>
    %84 = arith.mulf %77, %77 : vector<16x32xf32>
    %cst_44 = arith.constant dense<0.000000e+00> : vector<16xf32>
    %85 = vector.multi_reduction <add>, %84, %cst_44 [1] : vector<16x32xf32> to vector<16xf32>
    %86 = vector.shape_cast %85 : vector<16xf32> to vector<16x1xf32>
    %cst_45 = arith.constant 3.125000e-02 : f32
    %87 = vector.broadcast %cst_45 : f32 to vector<16x1xf32>
    %88 = arith.mulf %86, %87 : vector<16x1xf32>
    %89 = arith.mulf %83, %83 : vector<16x1xf32>
    %90 = arith.subf %88, %89 : vector<16x1xf32>
    %cst_46 = arith.constant 0.000000e+00 : f32
    %91 = vector.broadcast %cst_46 : f32 to vector<16x1xf32>
    %92 = arith.maximumf %90, %91 : vector<16x1xf32>
    %93 = vector.broadcast %83 : vector<16x1xf32> to vector<16x32xf32>
    %94 = arith.subf %77, %93 : vector<16x32xf32>
    %cst_47 = arith.constant 9.99999974E-6 : f32
    %95 = vector.broadcast %cst_47 : f32 to vector<16x1xf32>
    %96 = arith.addf %92, %95 : vector<16x1xf32>
    %97 = math.rsqrt %96 : vector<16x1xf32>
    %98 = vector.broadcast %97 : vector<16x1xf32> to vector<16x32xf32>
    %99 = arith.mulf %94, %98 : vector<16x32xf32>
    %100 = vector.broadcast %78 : vector<1x32xf32> to vector<16x32xf32>
    %101 = arith.mulf %99, %100 : vector<16x32xf32>
    %102 = vector.broadcast %79 : vector<1x32xf32> to vector<16x32xf32>
    %103 = arith.addf %101, %102 : vector<16x32xf32>
    %104 = arith.addf %103, %1 : vector<16x32xf32>
    %105 = vector.shape_cast %104 : vector<16x32xf32> to vector<2x8x32xf32>
    %c0_48 = arith.constant 0 : index
    %c0_49 = arith.constant 0 : index
    %c0_50 = arith.constant 0 : index
    %106 = vector.load %arg14[%c0_48, %c0_49, %c0_50] : memref<2x8x32xf32, #tpu.memory_space<vmem>>, vector<2x8x32xf32>
    tpu.vector_store %arg14[%c0_48, %c0_49, %c0_50], %105 {strides = array<i32>} : memref<2x8x32xf32, #tpu.memory_space<vmem>>, vector<2x8x32xf32>,
    return
  }
  func.func @transform_0(%arg0: i32) -> (i32, i32, i32) {
    %c0_i32 = arith.constant 0 : i32
    %c0_i32_0 = arith.constant 0 : i32
    %c0_i32_1 = arith.constant 0 : i32
    return %arg0, %c0_i32, %c0_i32_0 : i32, i32, i32
  }
  func.func @transform_1(%arg0: i32) -> (i32, i32) {
    %c0_i32 = arith.constant 0 : i32
    %c0_i32_0 = arith.constant 0 : i32
    %c0_i32_1 = arith.constant 0 : i32
    return %c0_i32, %c0_i32_0 : i32, i32
  }
  func.func @transform_2(%arg0: i32) -> (i32, i32) {
    %c0_i32 = arith.constant 0 : i32
    %c0_i32_0 = arith.constant 0 : i32
    %c0_i32_1 = arith.constant 0 : i32
    return %c0_i32, %c0_i32_0 : i32, i32
  }
  func.func @transform_3(%arg0: i32) -> (i32, i32) {
    %c0_i32 = arith.constant 0 : i32
    %c0_i32_0 = arith.constant 0 : i32
    %c0_i32_1 = arith.constant 0 : i32
    return %c0_i32, %c0_i32_0 : i32, i32
  }
  func.func @transform_4(%arg0: i32) -> (i32, i32) {
    %c0_i32 = arith.constant 0 : i32
    %c0_i32_0 = arith.constant 0 : i32
    %c0_i32_1 = arith.constant 0 : i32
    return %c0_i32, %c0_i32_0 : i32, i32
  }
  func.func @transform_5(%arg0: i32) -> (i32, i32) {
    %c0_i32 = arith.constant 0 : i32
    %c0_i32_0 = arith.constant 0 : i32
    %c0_i32_1 = arith.constant 0 : i32
    return %c0_i32, %c0_i32_0 : i32, i32
  }
  func.func @transform_6(%arg0: i32) -> (i32, i32) {
    %c0_i32 = arith.constant 0 : i32
    %c0_i32_0 = arith.constant 0 : i32
    %c0_i32_1 = arith.constant 0 : i32
    return %c0_i32, %c0_i32_0 : i32, i32
  }
  func.func @transform_7(%arg0: i32) -> (i32, i32) {
    %c0_i32 = arith.constant 0 : i32
    %c0_i32_0 = arith.constant 0 : i32
    %c0_i32_1 = arith.constant 0 : i32
    return %c0_i32, %c0_i32_0 : i32, i32
  }
  func.func @transform_8(%arg0: i32) -> (i32, i32) {
    %c0_i32 = arith.constant 0 : i32
    %c0_i32_0 = arith.constant 0 : i32
    %c0_i32_1 = arith.constant 0 : i32
    return %c0_i32, %c0_i32_0 : i32, i32
  }
  func.func @transform_9(%arg0: i32) -> (i32, i32) {
    %c0_i32 = arith.constant 0 : i32
    %c0_i32_0 = arith.constant 0 : i32
    %c0_i32_1 = arith.constant 0 : i32
    return %c0_i32, %c0_i32_0 : i32, i32
  }
  func.func @transform_10(%arg0: i32) -> (i32, i32) {
    %c0_i32 = arith.constant 0 : i32
    %c0_i32_0 = arith.constant 0 : i32
    %c0_i32_1 = arith.constant 0 : i32
    return %c0_i32, %c0_i32_0 : i32, i32
  }
  func.func @transform_11(%arg0: i32) -> (i32, i32) {
    %c0_i32 = arith.constant 0 : i32
    %c0_i32_0 = arith.constant 0 : i32
    %c0_i32_1 = arith.constant 0 : i32
    return %c0_i32, %c0_i32_0 : i32, i32
  }
  func.func @transform_12(%arg0: i32) -> (i32, i32) {
    %c0_i32 = arith.constant 0 : i32
    %c0_i32_0 = arith.constant 0 : i32
    %c0_i32_1 = arith.constant 0 : i32
    return %c0_i32, %c0_i32_0 : i32, i32
  }
  func.func @transform_13(%arg0: i32) -> (i32, i32, i32) {
    %c0_i32 = arith.constant 0 : i32
    %c0_i32_0 = arith.constant 0 : i32
    %c0_i32_1 = arith.constant 0 : i32
    return %arg0, %c0_i32, %c0_i32_0 : i32, i32, i32
  }
}

module attributes {stable_mosaic.version = 11 : i64} {
  func.func @_linear_kernel(%arg0: i32, %arg1: memref<16x8xf32, #tpu.memory_space<vmem>>, %arg2: memref<128x8xbf16, #tpu.memory_space<vmem>>, %arg3: memref<1x128xf32, #tpu.memory_space<vmem>>, %arg4: memref<16x128xf32, #tpu.memory_space<vmem>>) attributes {dimension_semantics = [#tpu.dimension_semantics<parallel>], iteration_bounds = array<i64: 1>, scalar_prefetch = 0 : i64, scratch_operands = 0 : i64, tpu.core_type = #tpu.core_type<tc>, window_params = [{transform_indices = @transform_0, window_bounds = array<i64: 16, 8>}, {pipeline_mode = #tpu.pipeline_mode<synchronous>, transform_indices = @transform_1, window_bounds = array<i64: 128, 8>}, {pipeline_mode = #tpu.pipeline_mode<synchronous>, transform_indices = @transform_2, window_bounds = array<i64: 1, 128>}, {transform_indices = @transform_3, window_bounds = array<i64: 16, 128>}]} {
    %c0 = arith.constant 0 : index
    %c0_0 = arith.constant 0 : index
    %0 = vector.load %arg1[%c0, %c0_0] : memref<16x8xf32, #tpu.memory_space<vmem>>, vector<16x8xf32>
    %1 = arith.truncf %0 : vector<16x8xf32> to vector<16x8xbf16>
    %c0_1 = arith.constant 0 : index
    %c0_2 = arith.constant 0 : index
    %2 = vector.load %arg2[%c0_1, %c0_2] : memref<128x8xbf16, #tpu.memory_space<vmem>>, vector<128x8xbf16>
    %cst = arith.constant dense<0.000000e+00> : vector<16x128xf32>
    %3 = tpu.matmul %1, %2, %cst {dimension_numbers = #tpu.dot_dimension_numbers<[1], [1], [0], [0], [0, 0, 1, 0], [], []>} : vector<16x8xbf16>, vector<128x8xbf16>, vector<16x128xf32> -> vector<16x128xf32>
    %c0_3 = arith.constant 0 : index
    %c0_4 = arith.constant 0 : index
    %4 = vector.load %arg3[%c0_3, %c0_4] : memref<1x128xf32, #tpu.memory_space<vmem>>, vector<1x128xf32>
    %5 = vector.broadcast %4 : vector<1x128xf32> to vector<16x128xf32>
    %6 = arith.addf %3, %5 : vector<16x128xf32>
    %c0_5 = arith.constant 0 : index
    %c0_6 = arith.constant 0 : index
    %7 = vector.load %arg4[%c0_5, %c0_6] : memref<16x128xf32, #tpu.memory_space<vmem>>, vector<16x128xf32>
    tpu.vector_store %arg4[%c0_5, %c0_6], %6 {strides = array<i32>} : memref<16x128xf32, #tpu.memory_space<vmem>>, vector<16x128xf32>,
    return
  }
  func.func @transform_0(%arg0: i32) -> (i32, i32) {
    %c0_i32 = arith.constant 0 : i32
    %c0_i32_0 = arith.constant 0 : i32
    return %arg0, %c0_i32 : i32, i32
  }
  func.func @transform_1(%arg0: i32) -> (i32, i32) {
    %c0_i32 = arith.constant 0 : i32
    %c0_i32_0 = arith.constant 0 : i32
    %c0_i32_1 = arith.constant 0 : i32
    return %c0_i32, %c0_i32_0 : i32, i32
  }
  func.func @transform_2(%arg0: i32) -> (i32, i32) {
    %c0_i32 = arith.constant 0 : i32
    %c0_i32_0 = arith.constant 0 : i32
    %c0_i32_1 = arith.constant 0 : i32
    return %c0_i32, %c0_i32_0 : i32, i32
  }
  func.func @transform_3(%arg0: i32) -> (i32, i32) {
    %c0_i32 = arith.constant 0 : i32
    %c0_i32_0 = arith.constant 0 : i32
    return %arg0, %c0_i32 : i32, i32
  }
}

module attributes {stable_mosaic.version = 11 : i64} {
  func.func @_ln_linear_kernel(%arg0: i32, %arg1: memref<16x32xf32, #tpu.memory_space<vmem>>, %arg2: memref<1x32xf32, #tpu.memory_space<vmem>>, %arg3: memref<1x32xf32, #tpu.memory_space<vmem>>, %arg4: memref<128x32xbf16, #tpu.memory_space<vmem>>, %arg5: memref<1x128xf32, #tpu.memory_space<vmem>>, %arg6: memref<16x128xf32, #tpu.memory_space<vmem>>) attributes {dimension_semantics = [#tpu.dimension_semantics<parallel>], iteration_bounds = array<i64: 1>, scalar_prefetch = 0 : i64, scratch_operands = 0 : i64, tpu.core_type = #tpu.core_type<tc>, window_params = [{transform_indices = @transform_0, window_bounds = array<i64: 16, 32>}, {pipeline_mode = #tpu.pipeline_mode<synchronous>, transform_indices = @transform_1, window_bounds = array<i64: 1, 32>}, {pipeline_mode = #tpu.pipeline_mode<synchronous>, transform_indices = @transform_2, window_bounds = array<i64: 1, 32>}, {pipeline_mode = #tpu.pipeline_mode<synchronous>, transform_indices = @transform_3, window_bounds = array<i64: 128, 32>}, {pipeline_mode = #tpu.pipeline_mode<synchronous>, transform_indices = @transform_4, window_bounds = array<i64: 1, 128>}, {transform_indices = @transform_5, window_bounds = array<i64: 16, 128>}]} {
    %c0 = arith.constant 0 : index
    %c0_0 = arith.constant 0 : index
    %0 = vector.load %arg1[%c0, %c0_0] : memref<16x32xf32, #tpu.memory_space<vmem>>, vector<16x32xf32>
    %c0_1 = arith.constant 0 : index
    %c0_2 = arith.constant 0 : index
    %1 = vector.load %arg2[%c0_1, %c0_2] : memref<1x32xf32, #tpu.memory_space<vmem>>, vector<1x32xf32>
    %c0_3 = arith.constant 0 : index
    %c0_4 = arith.constant 0 : index
    %2 = vector.load %arg3[%c0_3, %c0_4] : memref<1x32xf32, #tpu.memory_space<vmem>>, vector<1x32xf32>
    %cst = arith.constant dense<0.000000e+00> : vector<16xf32>
    %3 = vector.multi_reduction <add>, %0, %cst [1] : vector<16x32xf32> to vector<16xf32>
    %4 = vector.shape_cast %3 : vector<16xf32> to vector<16x1xf32>
    %cst_5 = arith.constant 3.125000e-02 : f32
    %5 = vector.broadcast %cst_5 : f32 to vector<16x1xf32>
    %6 = arith.mulf %4, %5 : vector<16x1xf32>
    %7 = arith.mulf %0, %0 : vector<16x32xf32>
    %cst_6 = arith.constant dense<0.000000e+00> : vector<16xf32>
    %8 = vector.multi_reduction <add>, %7, %cst_6 [1] : vector<16x32xf32> to vector<16xf32>
    %9 = vector.shape_cast %8 : vector<16xf32> to vector<16x1xf32>
    %cst_7 = arith.constant 3.125000e-02 : f32
    %10 = vector.broadcast %cst_7 : f32 to vector<16x1xf32>
    %11 = arith.mulf %9, %10 : vector<16x1xf32>
    %12 = arith.mulf %6, %6 : vector<16x1xf32>
    %13 = arith.subf %11, %12 : vector<16x1xf32>
    %cst_8 = arith.constant 0.000000e+00 : f32
    %14 = vector.broadcast %cst_8 : f32 to vector<16x1xf32>
    %15 = arith.maximumf %13, %14 : vector<16x1xf32>
    %16 = vector.broadcast %6 : vector<16x1xf32> to vector<16x32xf32>
    %17 = arith.subf %0, %16 : vector<16x32xf32>
    %cst_9 = arith.constant 9.99999974E-6 : f32
    %18 = vector.broadcast %cst_9 : f32 to vector<16x1xf32>
    %19 = arith.addf %15, %18 : vector<16x1xf32>
    %20 = math.rsqrt %19 : vector<16x1xf32>
    %21 = vector.broadcast %20 : vector<16x1xf32> to vector<16x32xf32>
    %22 = arith.mulf %17, %21 : vector<16x32xf32>
    %23 = vector.broadcast %1 : vector<1x32xf32> to vector<16x32xf32>
    %24 = arith.mulf %22, %23 : vector<16x32xf32>
    %25 = vector.broadcast %2 : vector<1x32xf32> to vector<16x32xf32>
    %26 = arith.addf %24, %25 : vector<16x32xf32>
    %27 = arith.truncf %26 : vector<16x32xf32> to vector<16x32xbf16>
    %c0_10 = arith.constant 0 : index
    %c0_11 = arith.constant 0 : index
    %28 = vector.load %arg4[%c0_10, %c0_11] : memref<128x32xbf16, #tpu.memory_space<vmem>>, vector<128x32xbf16>
    %cst_12 = arith.constant dense<0.000000e+00> : vector<16x128xf32>
    %29 = tpu.matmul %27, %28, %cst_12 {dimension_numbers = #tpu.dot_dimension_numbers<[1], [1], [0], [0], [0, 0, 1, 0], [], []>} : vector<16x32xbf16>, vector<128x32xbf16>, vector<16x128xf32> -> vector<16x128xf32>
    %c0_13 = arith.constant 0 : index
    %c0_14 = arith.constant 0 : index
    %30 = vector.load %arg5[%c0_13, %c0_14] : memref<1x128xf32, #tpu.memory_space<vmem>>, vector<1x128xf32>
    %31 = vector.broadcast %30 : vector<1x128xf32> to vector<16x128xf32>
    %32 = arith.addf %29, %31 : vector<16x128xf32>
    %33 = math.tanh %32 : vector<16x128xf32>
    %c0_15 = arith.constant 0 : index
    %c0_16 = arith.constant 0 : index
    %34 = vector.load %arg6[%c0_15, %c0_16] : memref<16x128xf32, #tpu.memory_space<vmem>>, vector<16x128xf32>
    tpu.vector_store %arg6[%c0_15, %c0_16], %33 {strides = array<i32>} : memref<16x128xf32, #tpu.memory_space<vmem>>, vector<16x128xf32>,
    return
  }
  func.func @transform_0(%arg0: i32) -> (i32, i32) {
    %c0_i32 = arith.constant 0 : i32
    %c0_i32_0 = arith.constant 0 : i32
    return %arg0, %c0_i32 : i32, i32
  }
  func.func @transform_1(%arg0: i32) -> (i32, i32) {
    %c0_i32 = arith.constant 0 : i32
    %c0_i32_0 = arith.constant 0 : i32
    %c0_i32_1 = arith.constant 0 : i32
    return %c0_i32, %c0_i32_0 : i32, i32
  }
  func.func @transform_2(%arg0: i32) -> (i32, i32) {
    %c0_i32 = arith.constant 0 : i32
    %c0_i32_0 = arith.constant 0 : i32
    %c0_i32_1 = arith.constant 0 : i32
    return %c0_i32, %c0_i32_0 : i32, i32
  }
  func.func @transform_3(%arg0: i32) -> (i32, i32) {
    %c0_i32 = arith.constant 0 : i32
    %c0_i32_0 = arith.constant 0 : i32
    %c0_i32_1 = arith.constant 0 : i32
    return %c0_i32, %c0_i32_0 : i32, i32
  }
  func.func @transform_4(%arg0: i32) -> (i32, i32) {
    %c0_i32 = arith.constant 0 : i32
    %c0_i32_0 = arith.constant 0 : i32
    %c0_i32_1 = arith.constant 0 : i32
    return %c0_i32, %c0_i32_0 : i32, i32
  }
  func.func @transform_5(%arg0: i32) -> (i32, i32) {
    %c0_i32 = arith.constant 0 : i32
    %c0_i32_0 = arith.constant 0 : i32
    return %arg0, %c0_i32 : i32, i32
  }
}

</mosaic_0001>

<bundles_post_ra>
// kernel: audio_mae_forward.11
= control target key start
LH: loop header
LB: loop body
LE: loop exit
PB: predicated region body
PF: predicated region fallthrough
CT: control target
= control target key end

     0   :  { %vm81_vm0 = vcmask 261120   ;;  %v219_v0 = vmov 0.0   ;;  %vm220_vm1 = vmmov 0   ;;  %s289_s1 = inlined_call_operand.vmem [shape: bf16[128,32], index: 1, kind: input, shape index: {}]   ;;  %s290_s0 = inlined_call_operand.vmem [shape: f32[16,32], index: 0, kind: input, shape index: {}]   ;;  %s291_s2 = inlined_call_operand.vmem [shape: f32[1,128], index: 2, kind: input, shape index: {}]   ;;  %s292_s3 = inlined_call_operand.vmem [shape: f32[16,128], index: 3, kind: output, shape index: {}]  }
   0x1   :  { %185 = vmatprep.subr.bf16.mxu0 %v219_v0  ;;  %v207_v1 = vld [vmem:[%s289_s1] sm:$0xff]   ;;  %201 = vmatprep.mubr.msk.bf16.mxu0 %vm220_vm1, %v219_v0  ;;  %v208_v3 = vld [vmem:[%s289_s1 + $0x8] sm:$0xff]   ;;  %v209_v5 = vld [vmem:[%s289_s1 + $0x10] sm:$0xff]  }
   0x2   :  { %v86_v2 = vsel %vm81_vm0, %v207_v1, 0  ;;  %v89_v4 = vsel %vm81_vm0, %v208_v3, 0  ;;  %v92_v6 = vsel %vm81_vm0, %v209_v5, 0  ;;  %v210_v7 = vld [vmem:[%s289_s1 + $0x18] sm:$0xff]   ;;  %v211_v9 = vld [vmem:[%s289_s1 + $0x20] sm:$0xff]   ;;  %v212_v11 = vld [vmem:[%s289_s1 + $0x28] sm:$0xff]  }
   0x3   :  { %186 = vmatpush3.bf16.xpose.msra.mxu0 %v86_v2  ;;  %v95_v8 = vsel %vm81_vm0, %v210_v7, 0  ;;  %v98_v10 = vsel %vm81_vm0, %v211_v9, 0  ;;  %v101_v12 = vsel %vm81_vm0, %v212_v11, 0  ;;  %v213_v13 = vld [vmem:[%s289_s1 + $0x30] sm:$0xff]   ;;  %v214_v15 = vld [vmem:[%s289_s1 + $0x38] sm:$0xff]   ;;  %v15_v17 = vld [vmem:[%s290_s0] sm:$0xff] }
   0x4   :  { %187 = vmatprep.subr.bf16.mxu0 %v219_v0  ;;  %v104_v14 = vsel %vm81_vm0, %v213_v13, 0  ;;  %v107_v16 = vsel %vm81_vm0, %v214_v15, 0  ;;  %v16_v18 = vld [vmem:[%s290_s0 + $0x8] sm:$0xff]  ;;  %v166_v20 = vld [vmem:[%s291_s2] ss:$0 sm:$0xff] }
   0x5   :  { %v17_v19 = vpack.c.bf16 %v16_v18, %v15_v17 }
   0xb   :  { %188 = vmatpush3.bf16.xpose.msra.mxu0 %v89_v4 }
   0xc   :  { %189 = vmatprep.subr.bf16.mxu0 %v219_v0 }
  0x13   :  { %190 = vmatpush3.bf16.xpose.msra.mxu0 %v92_v6 }
  0x14   :  { %191 = vmatprep.subr.bf16.mxu0 %v219_v0 }
  0x1b   :  { %192 = vmatpush3.bf16.xpose.msra.mxu0 %v95_v8 }
  0x1c   :  { %193 = vmatprep.subr.bf16.mxu0 %v219_v0 }
  0x23   :  { %194 = vmatpush3.bf16.xpose.msra.mxu0 %v98_v10 }
  0x24   :  { %195 = vmatprep.subr.bf16.mxu0 %v219_v0 }
  0x2b   :  { %196 = vmatpush3.bf16.xpose.msra.mxu0 %v101_v12 }
  0x2c   :  { %197 = vmatprep.subr.bf16.mxu0 %v219_v0 }
  0x33   :  { %198 = vmatpush3.bf16.xpose.msra.mxu0 %v104_v14 }
  0x34   :  { %199 = vmatprep.subr.bf16.mxu0 %v219_v0 }
  0x3b   :  { %200 = vmatpush3.bf16.xpose.msra.mxu0 %v107_v16 }
  0x42   :  { %202 = vmatmul.mubr.msk.bf16.vlgmr.msra.gmra.mrb[0].mxu0 %vm81_vm0, %v17_v19 }
 0x115   :  { %v143_v21 = vpop.f32.mrb[0].mxu0 }
 0x116   :  { %v144_v22 = vadd.f32 %v166_v20, %v143_v21  ;;  %v203_v23 = vpop.f32.mrb[1].mxu0 }
 0x117   :  { %v146_v24 = vpop.f32.mrb[2].mxu0 }
 0x118   :  { %v152_v25 = vmul.f32 0.70710677, %v144_v22  ;;  %v147_v26 = vadd.f32 %v166_v20, %v146_v24  ;;  %v204_v27 = vpop.f32.mrb[3].mxu0  ;;  %v150_v30 = vmul.f32 0.5, %v144_v22 }
 0x11a   :  { %215 = verf.f32 %v152_v25  ;;  %v153_v28 = vmul.f32 0.70710677, %v147_v26  ;;  %v151_v34 = vmul.f32 0.5, %v147_v26 }
 0x11c   :  { %217 = verf.f32 %v153_v28 }
 0x124   :  { %v216_v29 = vpop.eup %215 }
 0x125   :  { %v156_v31 = vadd.f32 1.0, %v216_v29 }
 0x126   :  { %v218_v32 = vpop.eup %217 }
 0x127   :  { %v158_v33 = vmul.f32 %v156_v31, %v150_v30  ;;  %v157_v35 = vadd.f32 1.0, %v218_v32 }
 0x129   :  { %160 = vst [vmem:[%s292_s3] sm:$0xff] %v158_v33  ;;  %v159_v36 = vmul.f32 %v157_v35, %v151_v34 }
 0x12b   :  { %161 = vst [vmem:[%s292_s3 + $0x8] sm:$0xff] %v159_v36 }

// kernel: audio_mae_forward.8
= control target key start
LH: loop header
LB: loop body
LE: loop exit
PB: predicated region body
PF: predicated region fallthrough
CT: control target
= control target key end

     0   :  { %vm81_vm0 = vcmask 130048   ;;  %v205_v0 = vmov 0.0   ;;  %vm206_vm1 = vmmov 0   ;;  %s275_s1 = inlined_call_operand.vmem [shape: bf16[128,16], index: 1, kind: input, shape index: {}]   ;;  %s276_s0 = inlined_call_operand.vmem [shape: f32[16,16], index: 0, kind: input, shape index: {}]   ;;  %s277_s2 = inlined_call_operand.vmem [shape: f32[1,128], index: 2, kind: input, shape index: {}]   ;;  %s278_s3 = inlined_call_operand.vmem [shape: f32[16,128], index: 3, kind: output, shape index: {}]  }
   0x1   :  { %175 = vmatprep.subr.bf16.mxu0 %v205_v0  ;;  %v197_v1 = vld [vmem:[%s275_s1] sm:$0xff]   ;;  %191 = vmatprep.mubr.msk.bf16.mxu0 %vm206_vm1, %v205_v0  ;;  %v198_v3 = vld [vmem:[%s275_s1 + $0x8] sm:$0xff]   ;;  %v199_v5 = vld [vmem:[%s275_s1 + $0x10] sm:$0xff]  }
   0x2   :  { %v86_v2 = vsel %vm81_vm0, %v197_v1, 0  ;;  %v89_v4 = vsel %vm81_vm0, %v198_v3, 0  ;;  %v92_v6 = vsel %vm81_vm0, %v199_v5, 0  ;;  %v200_v7 = vld [vmem:[%s275_s1 + $0x18] sm:$0xff]   ;;  %v201_v9 = vld [vmem:[%s275_s1 + $0x20] sm:$0xff]   ;;  %v202_v11 = vld [vmem:[%s275_s1 + $0x28] sm:$0xff]  }
   0x3   :  { %176 = vmatpush3.bf16.xpose.msra.mxu0 %v86_v2  ;;  %v95_v8 = vsel %vm81_vm0, %v200_v7, 0  ;;  %v98_v10 = vsel %vm81_vm0, %v201_v9, 0  ;;  %v101_v12 = vsel %vm81_vm0, %v202_v11, 0  ;;  %v203_v13 = vld [vmem:[%s275_s1 + $0x30] sm:$0xff]   ;;  %v204_v15 = vld [vmem:[%s275_s1 + $0x38] sm:$0xff]   ;;  %v15_v17 = vld [vmem:[%s276_s0] sm:$0xff] }
   0x4   :  { %177 = vmatprep.subr.bf16.mxu0 %v205_v0  ;;  %v104_v14 = vsel %vm81_vm0, %v203_v13, 0  ;;  %v107_v16 = vsel %vm81_vm0, %v204_v15, 0  ;;  %v16_v18 = vld [vmem:[%s276_s0 + $0x8] sm:$0xff]  ;;  %v156_v20 = vld [vmem:[%s277_s2] ss:$0 sm:$0xff] }
   0x5   :  { %v17_v19 = vpack.c.bf16 %v16_v18, %v15_v17 }
   0xb   :  { %178 = vmatpush3.bf16.xpose.msra.mxu0 %v89_v4 }
   0xc   :  { %179 = vmatprep.subr.bf16.mxu0 %v205_v0 }
  0x13   :  { %180 = vmatpush3.bf16.xpose.msra.mxu0 %v92_v6 }
  0x14   :  { %181 = vmatprep.subr.bf16.mxu0 %v205_v0 }
  0x1b   :  { %182 = vmatpush3.bf16.xpose.msra.mxu0 %v95_v8 }
  0x1c   :  { %183 = vmatprep.subr.bf16.mxu0 %v205_v0 }
  0x23   :  { %184 = vmatpush3.bf16.xpose.msra.mxu0 %v98_v10 }
  0x24   :  { %185 = vmatprep.subr.bf16.mxu0 %v205_v0 }
  0x2b   :  { %186 = vmatpush3.bf16.xpose.msra.mxu0 %v101_v12 }
  0x2c   :  { %187 = vmatprep.subr.bf16.mxu0 %v205_v0 }
  0x33   :  { %188 = vmatpush3.bf16.xpose.msra.mxu0 %v104_v14 }
  0x34   :  { %189 = vmatprep.subr.bf16.mxu0 %v205_v0 }
  0x3b   :  { %190 = vmatpush3.bf16.xpose.msra.mxu0 %v107_v16 }
  0x42   :  { %192 = vmatmul.mubr.msk.bf16.vlgmr.msra.gmra.mrb[0].mxu0 %vm81_vm0, %v17_v19 }
 0x115   :  { %v143_v21 = vpop.f32.mrb[0].mxu0 }
 0x116   :  { %v144_v22 = vadd.f32 %v156_v20, %v143_v21  ;;  %v193_v23 = vpop.f32.mrb[1].mxu0 }
 0x117   :  { %v146_v24 = vpop.f32.mrb[2].mxu0 }
 0x118   :  { %150 = vst [vmem:[%s278_s3] sm:$0xff] %v144_v22  ;;  %v147_v25 = vadd.f32 %v156_v20, %v146_v24  ;;  %v194_v26 = vpop.f32.mrb[3].mxu0 }
 0x11a   :  { %151 = vst [vmem:[%s278_s3 + $0x8] sm:$0xff] %v147_v25 }

// kernel: audio_mae_forward.12
= control target key start
LH: loop header
LB: loop body
LE: loop exit
PB: predicated region body
PF: predicated region fallthrough
CT: control target
= control target key end

     0   :  { %vm81_vm0 = vcmask 64512   ;;  %v205_v0 = vmov 0.0   ;;  %vm206_vm1 = vmmov 0   ;;  %s275_s1 = inlined_call_operand.vmem [shape: bf16[128,8], index: 1, kind: input, shape index: {}]   ;;  %s276_s0 = inlined_call_operand.vmem [shape: f32[16,8], index: 0, kind: input, shape index: {}]   ;;  %s277_s2 = inlined_call_operand.vmem [shape: f32[1,128], index: 2, kind: input, shape index: {}]   ;;  %s278_s3 = inlined_call_operand.vmem [shape: f32[16,128], index: 3, kind: output, shape index: {}]  }
   0x1   :  { %175 = vmatprep.subr.bf16.mxu0 %v205_v0  ;;  %v197_v1 = vld [vmem:[%s275_s1] sm:$0xff]   ;;  %191 = vmatprep.mubr.msk.bf16.mxu0 %vm206_vm1, %v205_v0  ;;  %v198_v3 = vld [vmem:[%s275_s1 + $0x8] sm:$0xff]   ;;  %v199_v5 = vld [vmem:[%s275_s1 + $0x10] sm:$0xff]  }
   0x2   :  { %v86_v2 = vsel %vm81_vm0, %v197_v1, 0  ;;  %v89_v4 = vsel %vm81_vm0, %v198_v3, 0  ;;  %v92_v6 = vsel %vm81_vm0, %v199_v5, 0  ;;  %v200_v7 = vld [vmem:[%s275_s1 + $0x18] sm:$0xff]   ;;  %v201_v9 = vld [vmem:[%s275_s1 + $0x20] sm:$0xff]   ;;  %v202_v11 = vld [vmem:[%s275_s1 + $0x28] sm:$0xff]  }
   0x3   :  { %176 = vmatpush3.bf16.xpose.msra.mxu0 %v86_v2  ;;  %v95_v8 = vsel %vm81_vm0, %v200_v7, 0  ;;  %v98_v10 = vsel %vm81_vm0, %v201_v9, 0  ;;  %v101_v12 = vsel %vm81_vm0, %v202_v11, 0  ;;  %v203_v13 = vld [vmem:[%s275_s1 + $0x30] sm:$0xff]   ;;  %v204_v15 = vld [vmem:[%s275_s1 + $0x38] sm:$0xff]   ;;  %v15_v17 = vld [vmem:[%s276_s0] sm:$0xff] }
   0x4   :  { %177 = vmatprep.subr.bf16.mxu0 %v205_v0  ;;  %v104_v14 = vsel %vm81_vm0, %v203_v13, 0  ;;  %v107_v16 = vsel %vm81_vm0, %v204_v15, 0  ;;  %v16_v18 = vld [vmem:[%s276_s0 + $0x8] sm:$0xff]  ;;  %v156_v20 = vld [vmem:[%s277_s2] ss:$0 sm:$0xff] }
   0x5   :  { %v17_v19 = vpack.c.bf16 %v16_v18, %v15_v17 }
   0xb   :  { %178 = vmatpush3.bf16.xpose.msra.mxu0 %v89_v4 }
   0xc   :  { %179 = vmatprep.subr.bf16.mxu0 %v205_v0 }
  0x13   :  { %180 = vmatpush3.bf16.xpose.msra.mxu0 %v92_v6 }
  0x14   :  { %181 = vmatprep.subr.bf16.mxu0 %v205_v0 }
  0x1b   :  { %182 = vmatpush3.bf16.xpose.msra.mxu0 %v95_v8 }
  0x1c   :  { %183 = vmatprep.subr.bf16.mxu0 %v205_v0 }
  0x23   :  { %184 = vmatpush3.bf16.xpose.msra.mxu0 %v98_v10 }
  0x24   :  { %185 = vmatprep.subr.bf16.mxu0 %v205_v0 }
  0x2b   :  { %186 = vmatpush3.bf16.xpose.msra.mxu0 %v101_v12 }
  0x2c   :  { %187 = vmatprep.subr.bf16.mxu0 %v205_v0 }
  0x33   :  { %188 = vmatpush3.bf16.xpose.msra.mxu0 %v104_v14 }
  0x34   :  { %189 = vmatprep.subr.bf16.mxu0 %v205_v0 }
  0x3b   :  { %190 = vmatpush3.bf16.xpose.msra.mxu0 %v107_v16 }
  0x42   :  { %192 = vmatmul.mubr.msk.bf16.vlgmr.msra.gmra.mrb[0].mxu0 %vm81_vm0, %v17_v19 }
 0x115   :  { %v143_v21 = vpop.f32.mrb[0].mxu0 }
 0x116   :  { %v144_v22 = vadd.f32 %v156_v20, %v143_v21  ;;  %v193_v23 = vpop.f32.mrb[1].mxu0 }
 0x117   :  { %v146_v24 = vpop.f32.mrb[2].mxu0 }
 0x118   :  { %150 = vst [vmem:[%s278_s3] sm:$0xff] %v144_v22  ;;  %v147_v25 = vadd.f32 %v156_v20, %v146_v24  ;;  %v194_v26 = vpop.f32.mrb[3].mxu0 }
 0x11a   :  { %151 = vst [vmem:[%s278_s3 + $0x8] sm:$0xff] %v147_v25 }

// kernel: audio_mae_forward.9
= control target key start
LH: loop header
LB: loop body
LE: loop exit
PB: predicated region body
PF: predicated region fallthrough
CT: control target
= control target key end

     0   :  { %vm83_vm0 = vcmask 261120   ;;  %v644_v0 = vmov 0.0   ;;  %vm645_vm1 = vmmov 0   ;;  %vm250_vm2 = vcmask 523264   ;;  %s839_s3 = inlined_call_operand.vmem [shape: bf16[64,32], index: 3, kind: input, shape index: {}]   ;;  %s840_s0 = inlined_call_operand.vmem [shape: f32[2,8,32], index: 0, kind: input, shape index: {}]   ;;  %s841_s1 = inlined_call_operand.vmem [shape: bf16[64,32], index: 1, kind: input, shape index: {}]   ;;  %s842_s4 = inlined_call_operand.vmem [shape: f32[1,64], index: 4, kind: input, shape index: {}]   ;;  %s843_s8 = inlined_call_operand.vmem [shape: f32[8,1], index: 8, kind: input, shape index: {}]   ;;  %s844_s5 = inlined_call_operand.vmem [shape: f32[1,64], index: 5, kind: input, shape index: {}]   ;;  %s845_s6 = inlined_call_operand.vmem [shape: f32[1,64], index: 6, kind: input, shape index: {}]   ;;  %s846_s7 = inlined_call_operand.vmem [shape: bf16[8,8], index: 7, kind: input, shape index: {}]   ;;  %s847_s9 = inlined_call_operand.vmem [shape: bf16[32,64], index: 9, kind: input, shape index: {}]   ;;  %s848_s2 = inlined_call_operand.vmem [shape: f32[1,64], index: 2, kind: input, shape index: {}]   ;;  %s849_s10 = inlined_call_operand.vmem [shape: f32[1,32], index: 10, kind: input, shape index: {}]   ;;  %s850_s11 = inlined_call_operand.vmem [shape: f32[1,32], index: 11, kind: input, shape index: {}]   ;;  %s851_s12 = inlined_call_operand.vmem [shape: f32[1,32], index: 12, kind: input, shape index: {}]   ;;  %s852_s13 = inlined_call_operand.vmem [shape: f32[2,8,32], index: 13, kind: output, shape index: {}]  }
   0x1   :  { %582 = vmatprep.subr.bf16.mxu1 %v644_v0  ;;  %v618_v1 = vld [vmem:[%s839_s3] sm:$0xff]   ;;  %590 = vmatprep.mubr.msk.bf16.mxu1 %vm645_vm1, %v644_v0  ;;  %v619_v3 = vld [vmem:[%s839_s3 + $0x8] sm:$0xff]   ;;  %v620_v5 = vld [vmem:[%s839_s3 + $0x10] sm:$0xff]   ;;  %v646_v43 = vmov 0   ;;  %vm311_vm3 = vcmask 1043456   ;;  %vm307_vm4 = vcmask 64512  }
   0x2   :  { %570 = vmatprep.subr.bf16.mxu0 %v644_v0  ;;  %578 = vmatprep.mubr.msk.bf16.mxu0 %vm645_vm1, %v644_v0  ;;  %v186_v2 = vsel %vm83_vm0, %v618_v1, 0  ;;  %v189_v4 = vsel %vm83_vm0, %v619_v3, 0  ;;  %v192_v6 = vsel %vm83_vm0, %v620_v5, 0  ;;  %v621_v7 = vld [vmem:[%s839_s3 + $0x18] sm:$0xff]   ;;  %v745_v9 = vld [vmem:[%s840_s0] sm:$0xff]  ;;  %v750_v10 = vld [vmem:[%s840_s0 + $0x8] sm:$0xff] }
   0x3   :  { %583 = vmatpush3.bf16.xpose.msra.mxu1 %v186_v2  ;;  %v195_v8 = vsel %vm83_vm0, %v621_v7, 0  ;;  %v47_v11 = vpack.c.bf16 %v750_v10, %v745_v9  ;;  %v622_v12 = vld [vmem:[%s841_s1] sm:$0xff]   ;;  %v623_v14 = vld [vmem:[%s841_s1 + $0x8] sm:$0xff]   ;;  %v624_v16 = vld [vmem:[%s841_s1 + $0x10] sm:$0xff]   ;;  %617 = vset.pattern.permute.xlu0 %v646_v43 }
   0x4   :  { %584 = vmatprep.subr.bf16.mxu1 %v644_v0  ;;  %v88_v13 = vsel %vm83_vm0, %v622_v12, 0  ;;  %v91_v15 = vsel %vm83_vm0, %v623_v14, 0  ;;  %v94_v17 = vsel %vm83_vm0, %v624_v16, 0  ;;  %v537_v18 = vld [vmem:[%s842_s4] ss:$0 sm:$0xff]  ;;  %v625_v41 = vld [vmem:[%s841_s1 + $0x18] sm:$0xff]  }
   0x5   :  { %571 = vmatpush3.bf16.xpose.msra.mxu0 %v88_v13  ;;  %v97_v42 = vsel %vm83_vm0, %v625_v41, 0  ;;  %v300_v44 = vld [vmem:[%s843_s8] sm:$0xff] }
   0x6   :  { %572 = vmatprep.subr.bf16.mxu0 %v644_v0  ;;  %v543_v63 = vld [vmem:[%s844_s5] ss:$0 sm:$0xff] }
   0xb   :  { %585 = vmatpush3.bf16.xpose.msra.mxu1 %v189_v4  ;;  %v544_v4 = vld [vmem:[%s845_s6] ss:$0 sm:$0xff] }
   0xc   :  { %586 = vmatprep.subr.bf16.mxu1 %v644_v0 }
   0xd   :  { %573 = vmatpush3.bf16.xpose.msra.mxu0 %v91_v15  ;;  %v299_v15 = vld [vmem:[%s846_s7] sm:$0xf] }
   0xe   :  { %574 = vmatprep.subr.bf16.mxu0 %v644_v0 }
  0x13   :  { %587 = vmatpush3.bf16.xpose.msra.mxu1 %v192_v6 }
  0x14   :  { %588 = vmatprep.subr.bf16.mxu1 %v644_v0 }
  0x15   :  { %575 = vmatpush3.bf16.xpose.msra.mxu0 %v94_v17 }
  0x16   :  { %576 = vmatprep.subr.bf16.mxu0 %v644_v0 }
  0x1b   :  { %589 = vmatpush3.bf16.xpose.msra.mxu1 %v195_v8 }
  0x1c   :  { %594 = vmatprep.subr.bf16.mxu1 %v644_v0 }
  0x1d   :  { %577 = vmatpush3.bf16.xpose.msra.mxu0 %v97_v42 }
  0x1e   :  { %606 = vmatprep.subr.bf16.mxu0 %v644_v0 }
  0x22   :  { %591 = vmatmul.mubr.msk.bf16.vlgmr.msra.gmra.mrb[0].mxu1 %vm83_vm0, %v47_v11 }
  0x23   :  { %596 = vmatprep.mubr.msk.bf16.mxu1 %vm645_vm1, %v644_v0 }
  0x24   :  { %579 = vmatmul.mubr.msk.bf16.vlgmr.msra.gmra.mrb[0].mxu0 %vm83_vm0, %v47_v11 }
  0x25   :  { %610 = vmatprep.mubr.msk.bf16.mxu0 %vm645_vm1, %v644_v0 }
  0xf5   :  { %v231_v19 = vpop.f32.mrb[0].mxu1 }
  0xf6   :  { %v232_v20 = vadd.f32 %v537_v18, %v231_v19  ;;  %v592_v21 = vpop.f32.mrb[1].mxu1 }
  0xf7   :  { %v234_v22 = vpop.f32.mrb[2].mxu1  ;;  %v133_v17 = vpop.f32.mrb[0].mxu0  ;;  %v626_v21 = vld [vmem:[%s847_s9] sm:$0xff]  }
  0xf8   :  { %v240_v23 = vmul.f32 0.70710677, %v232_v20  ;;  %v235_v24 = vadd.f32 %v537_v18, %v234_v22  ;;  %v593_v25 = vpop.f32.mrb[3].mxu1  ;;  %v238_v28 = vmul.f32 0.5, %v232_v20  ;;  %v580_v18 = vpop.f32.mrb[1].mxu0  ;;  %v427_v22 = vsel %vm250_vm2, %v626_v21, 0 }
  0xf9   :  { %v136_v19 = vpop.f32.mrb[2].mxu0  ;;  %607 = vmatpush3.bf16.xpose.msra.mxu0 %v427_v22  ;;  %v531_v25 = vld [vmem:[%s848_s2] ss:$0 sm:$0xff] }
  0xfa   :  { %628 = verf.f32 %v240_v23  ;;  %v241_v26 = vmul.f32 0.70710677, %v235_v24  ;;  %v239_v31 = vmul.f32 0.5, %v235_v24  ;;  %v581_v20 = vpop.f32.mrb[3].mxu0  ;;  %608 = vmatprep.subr.bf16.mxu0 %v644_v0  ;;  %v627_v23 = vld [vmem:[%s847_s9 + $0x8] sm:$0xff]  }
  0xfb   :  { %v430_v24 = vsel %vm250_vm2, %v627_v23, 0  ;;  %v551_v21 = vld [vmem:[%s850_s11] ss:$0 sm:$0xff] }
  0xfc   :  { %630 = verf.f32 %v241_v26  ;;  %v134_v26 = vadd.f32 %v531_v25, %v133_v17  ;;  %v552_v23 = vld [vmem:[%s851_s12] ss:$0 sm:$0xff] }
 0x101   :  { %609 = vmatpush3.bf16.xpose.msra.mxu0 %v430_v24 }
 0x104   :  { %v629_v27 = vpop.eup %628 }
 0x105   :  { %v244_v29 = vadd.f32 1.0, %v629_v27  ;;  %v142_v27 = vmul.f32 0.70710677, %v134_v26 }
 0x106   :  { %v631_v30 = vpop.eup %630 }
 0x107   :  { %v245_v32 = vadd.f32 1.0, %v631_v30  ;;  %v246_v33 = vmul.f32 %v244_v29, %v238_v28  ;;  %v137_v28 = vadd.f32 %v531_v25, %v136_v19 }
 0x109   :  { %v251_v34 = vsel %vm250_vm2, %v246_v33, 0.0  ;;  %v247_v35 = vmul.f32 %v245_v32, %v239_v31  ;;  %v259_v36 = vmul.f32 %v246_v33, %v246_v33  ;;  %v143_v29 = vmul.f32 0.70710677, %v137_v28 }
 0x10a   :  { %252 = vadd.xlane.f32.xlu0 %v251_v34  ;;  %v140_v31 = vmul.f32 0.5, %v134_v26  ;;  %v141_v41 = vmul.f32 0.5, %v137_v28 }
 0x10b   :  { %v254_v37 = vsel %vm250_vm2, %v247_v35, 0.0  ;;  %v260_v38 = vmul.f32 %v247_v35, %v247_v35  ;;  %v261_v39 = vsel %vm250_vm2, %v259_v36, 0.0 }
 0x10c   :  { %255 = vadd.xlane.f32.xlu1 %v254_v37 }
 0x10d   :  { %v264_v40 = vsel %vm250_vm2, %v260_v38, 0.0 }
 0x10e   :  { %262 = vadd.xlane.f32.xlu0 %v261_v39 }
 0x110   :  { %265 = vadd.xlane.f32.xlu1 %v264_v40 }
 0x124   :  { %304 = vperm.xlu0 %617, %v300_v44  }
 0x197   :  { %v253_v45 = vpop.xlane.xlu0 %252 }
 0x198   :  { %v257_v46 = vmul.f32 0.015625, %v253_v45 }
 0x199   :  { %v256_v47 = vpop.xlane.xlu1 %255 }
 0x19a   :  { %v258_v48 = vmul.f32 0.015625, %v256_v47  ;;  %v269_v50 = vmul.f32 %v257_v46, %v257_v46  ;;  %v275_v61 = vsub.f32 %v246_v33, %v257_v46 }
 0x19b   :  { %v263_v49 = vpop.xlane.xlu0 %262 }
 0x19c   :  { %v267_v51 = vmul.f32 0.015625, %v263_v49  ;;  %v270_v53 = vmul.f32 %v258_v48, %v258_v48  ;;  %v276_v1 = vsub.f32 %v247_v35, %v258_v48 }
 0x19d   :  { %v266_v52 = vpop.xlane.xlu1 %265 }
 0x19e   :  { %v271_v54 = vsub.f32 %v267_v51, %v269_v50  ;;  %v268_v55 = vmul.f32 0.015625, %v266_v52  ;;  %v547_v51 = vld [vmem:[%s849_s10] ss:$0 sm:$0xff] }
 0x1a0   :  { %v273_v56 = vmax.f32 %v271_v54, 0.0  ;;  %v272_v57 = vsub.f32 %v268_v55, %v270_v53 }
 0x1a2   :  { %v277_v58 = vadd.f32 1e-05, %v273_v56  ;;  %v274_v59 = vmax.f32 %v272_v57, 0.0 }
 0x1a3   :  { %v305_v32 = vpop.permute.xlu0 %304 }
 0x1a4   :  { %632 = vrsqrt.f32 %v277_v58  ;;  %v278_v60 = vadd.f32 1e-05, %v274_v59 }
 0x1a6   :  { %634 = vrsqrt.f32 %v278_v60 }
 0x1a7   :  { %636 = verf.f32 %v142_v27 }
 0x1a8   :  { %638 = verf.f32 %v143_v29 }
 0x1ae   :  { %v633_v62 = vpop.eup %632 }
 0x1af   :  { %v281_v2 = vmul.f32 %v633_v62, %v275_v61 }
 0x1b0   :  { %v635_v3 = vpop.eup %634 }
 0x1b1   :  { %v289_v5 = vmul.f32 %v543_v63, %v281_v2  ;;  %v282_v6 = vmul.f32 %v635_v3, %v276_v1  ;;  %v637_v30 = vpop.eup %636 }
 0x1b2   :  { %v639_v37 = vpop.eup %638 }
 0x1b3   :  { %v297_v7 = vadd.f32 %v544_v4, %v289_v5  ;;  %v290_v8 = vmul.f32 %v543_v63, %v282_v6  ;;  %v147_v42 = vadd.f32 1.0, %v639_v37 }
 0x1b5   :  { %v301_v11 = vpack.c.bf16 %v297_v7, %v297_v7  ;;  %v298_v12 = vadd.f32 %v544_v4, %v290_v8  ;;  %v149_v44 = vmul.f32 %v147_v42, %v141_v41 }
 0x1b7   :  { %v313_v13 = vsel %vm311_vm3, %v301_v11, 0  ;;  %v356_v14 = vpack.c.bf16 %v298_v12, %v298_v12 }
 0x1b8   :  { %595 = vmatpush3.bf16.msra.mxu1 %v313_v13 }
 0x1b9   :  { %600 = vmatprep.subr.bf16.mxu1 %v644_v0  ;;  %v358_v16 = vsel %vm311_vm3, %v356_v14, 0 }
 0x1bb   :  { %597 = vmatmul.mubr.msk.bf16.vlgmr.msra.gmra.mrb[4].mxu1 %vm307_vm4, %v299_v15 }
 0x1bc   :  { %601 = vmatpush3.bf16.msra.mxu1 %v358_v16  ;;  %602 = vmatprep.mubr.msk.bf16.mxu1 %vm645_vm1, %v644_v0  ;;  %v146_v0 = vadd.f32 1.0, %v637_v30 }
 0x1be   :  { %v148_v34 = vmul.f32 %v146_v0, %v140_v31 }
 0x1c3   :  { %603 = vmatmul.mubr.msk.bf16.vlgmr.msra.gmra.mrb[8].mxu1 %vm307_vm4, %v299_v15 }
 0x28e   :  { %v349_v33 = vpop.f32.mrb[4].mxu1 }
 0x28f   :  { %v350_v35 = vadd.f32 %v349_v33, %v305_v32  ;;  %v598_v36 = vpop.f32.mrb[5].mxu1 }
 0x290   :  { %v352_v38 = vpop.f32.mrb[6].mxu1 }
 0x291   :  { %v355_v39 = vmul.f32 %v350_v35, %v148_v34  ;;  %v599_v40 = vpop.f32.mrb[7].mxu1 }
 0x296   :  { %v394_v43 = vpop.f32.mrb[8].mxu1 }
 0x297   :  { %v395_v45 = vadd.f32 %v394_v43, %v305_v32  ;;  %v604_v46 = vpop.f32.mrb[9].mxu1 }
 0x298   :  { %v397_v47 = vpop.f32.mrb[10].mxu1 }
 0x299   :  { %v400_v48 = vmul.f32 %v395_v45, %v149_v44  ;;  %v605_v49 = vpop.f32.mrb[11].mxu1 }
 0x29b   :  { %v401_v50 = vpack.c.bf16 %v400_v48, %v355_v39 }
 0x29d   :  { %611 = vmatmul.mubr.msk.bf16.vlgmr.msra.gmra.mrb[4].mxu0 %vm250_vm2, %v401_v50 }
 0x370   :  { %v466_v52 = vpop.f32.mrb[4].mxu0 }
 0x371   :  { %v467_v53 = vadd.f32 %v547_v51, %v466_v52  ;;  %v612_v54 = vpop.f32.mrb[5].mxu0 }
 0x372   :  { %v469_v55 = vpop.f32.mrb[6].mxu0 }
 0x373   :  { %v470_v56 = vadd.f32 %v547_v51, %v469_v55  ;;  %v613_v57 = vpop.f32.mrb[7].mxu0  ;;  %v475_v58 = vsel %vm83_vm0, %v467_v53, 0.0  ;;  %v483_v60 = vmul.f32 %v467_v53, %v467_v53 }
 0x374   :  { %476 = vadd.xlane.f32.xlu1 %v475_v58 }
 0x375   :  { %v478_v59 = vsel %vm83_vm0, %v470_v56, 0.0  ;;  %v485_v61 = vsel %vm83_vm0, %v483_v60, 0.0  ;;  %v484_v62 = vmul.f32 %v470_v56, %v470_v56 }
 0x377   :  { %v488_v63 = vsel %vm83_vm0, %v484_v62, 0.0 }
 0x378   :  { %479 = vadd.xlane.f32.xlu1 %v478_v59 }
 0x37c   :  { %486 = vadd.xlane.f32.xlu1 %v485_v61 }
 0x380   :  { %489 = vadd.xlane.f32.xlu1 %v488_v63 }
 0x401   :  { %v477_v1 = vpop.xlane.xlu1 %476 }
 0x402   :  { %v481_v3 = vmul.f32 0.03125, %v477_v1 }
 0x404   :  { %v493_v5 = vmul.f32 %v481_v3, %v481_v3  ;;  %v499_v19 = vsub.f32 %v467_v53, %v481_v3 }
 0x405   :  { %v480_v2 = vpop.xlane.xlu1 %479 }
 0x406   :  { %v482_v6 = vmul.f32 0.03125, %v480_v2 }
 0x408   :  { %v494_v12 = vmul.f32 %v482_v6, %v482_v6  ;;  %v500_v24 = vsub.f32 %v470_v56, %v482_v6 }
 0x409   :  { %v487_v4 = vpop.xlane.xlu1 %486 }
 0x40a   :  { %v491_v7 = vmul.f32 0.03125, %v487_v4 }
 0x40c   :  { %v495_v8 = vsub.f32 %v491_v7, %v493_v5 }
 0x40d   :  { %v490_v11 = vpop.xlane.xlu1 %489 }
 0x40e   :  { %v497_v13 = vmax.f32 %v495_v8, 0.0  ;;  %v492_v14 = vmul.f32 0.03125, %v490_v11 }
 0x410   :  { %v501_v15 = vadd.f32 1e-05, %v497_v13  ;;  %v496_v16 = vsub.f32 %v492_v14, %v494_v12 }
 0x412   :  { %640 = vrsqrt.f32 %v501_v15  ;;  %v498_v17 = vmax.f32 %v496_v16, 0.0 }
 0x414   :  { %v502_v18 = vadd.f32 1e-05, %v498_v17 }
 0x416   :  { %642 = vrsqrt.f32 %v502_v18 }
 0x41c   :  { %v641_v20 = vpop.eup %640 }
 0x41d   :  { %v505_v22 = vmul.f32 %v641_v20, %v499_v19 }
 0x41f   :  { %v513_v25 = vmul.f32 %v551_v21, %v505_v22 }
 0x420   :  { %v643_v26 = vpop.eup %642 }
 0x421   :  { %v521_v27 = vadd.f32 %v552_v23, %v513_v25  ;;  %v506_v28 = vmul.f32 %v643_v26, %v500_v24 }
 0x423   :  { %v523_v29 = vadd.f32 %v521_v27, %v745_v9  ;;  %v514_v30 = vmul.f32 %v551_v21, %v506_v28 }
 0x425   :  { %525 = vst.msk [vmem:[%s852_s13] sm:$0xff] %vm83_vm0, %v523_v29  ;;  %v522_v31 = vadd.f32 %v552_v23, %v514_v30 }
 0x427   :  { %v524_v0 = vadd.f32 %v522_v31, %v750_v10 }
 0x429   :  { %526 = vst.msk [vmem:[%s852_s13 + $0x8] sm:$0xff] %vm83_vm0, %v524_v0 }

// kernel: audio_mae_forward.15
= control target key start
LH: loop header
LB: loop body
LE: loop exit
PB: predicated region body
PF: predicated region fallthrough
CT: control target
= control target key end

     0   :  { %vm25_vm0 = vcmask 261120   ;;  %v273_v2 = vmov 0.0   ;;  %vm274_vm1 = vmmov 0   ;;  %s375_s0 = inlined_call_operand.vmem [shape: f32[16,32], index: 0, kind: input, shape index: {}]   ;;  %s376_s3 = inlined_call_operand.vmem [shape: bf16[128,32], index: 3, kind: input, shape index: {}]   ;;  %s377_s1 = inlined_call_operand.vmem [shape: f32[1,32], index: 1, kind: input, shape index: {}]   ;;  %s378_s2 = inlined_call_operand.vmem [shape: f32[1,32], index: 2, kind: input, shape index: {}]   ;;  %s379_s4 = inlined_call_operand.vmem [shape: f32[1,128], index: 4, kind: input, shape index: {}]   ;;  %s380_s5 = inlined_call_operand.vmem [shape: f32[16,128], index: 5, kind: output, shape index: {}]  }
   0x1   :  { %v308_v0 = vld [vmem:[%s375_s0] sm:$0xff]  ;;  %v313_v1 = vld [vmem:[%s375_s0 + $0x8] sm:$0xff]  ;;  %235 = vmatprep.subr.bf16.mxu0 %v273_v2  ;;  %v259_v13 = vld [vmem:[%s376_s3 + $0x10] sm:$0xff]   ;;  %251 = vmatprep.mubr.msk.bf16.mxu0 %vm274_vm1, %v273_v2 }
   0x2   :  { %v26_v3 = vsel %vm25_vm0, %v308_v0, 0.0  ;;  %v34_v4 = vmul.f32 %v308_v0, %v308_v0  ;;  %v35_v5 = vmul.f32 %v313_v1, %v313_v1  ;;  %v257_v6 = vld [vmem:[%s376_s3] sm:$0xff]   ;;  %v29_v8 = vsel %vm25_vm0, %v313_v1, 0.0  ;;  %v258_v11 = vld [vmem:[%s376_s3 + $0x8] sm:$0xff]   ;;  %v260_v15 = vld [vmem:[%s376_s3 + $0x18] sm:$0xff]  }
   0x3   :  { %27 = vadd.xlane.f32.xlu0 %v26_v3  ;;  %v142_v9 = vsel %vm25_vm0, %v257_v6, 0  ;;  %v145_v12 = vsel %vm25_vm0, %v258_v11, 0  ;;  %v148_v14 = vsel %vm25_vm0, %v259_v13, 0  ;;  %v151_v16 = vsel %vm25_vm0, %v260_v15, 0  ;;  %v261_v17 = vld [vmem:[%s376_s3 + $0x20] sm:$0xff]   ;;  %v262_v19 = vld [vmem:[%s376_s3 + $0x28] sm:$0xff]  }
   0x4   :  { %v36_v7 = vsel %vm25_vm0, %v34_v4, 0.0  ;;  %236 = vmatpush3.bf16.xpose.msra.mxu0 %v142_v9  ;;  %v39_v10 = vsel %vm25_vm0, %v35_v5, 0.0  ;;  %v154_v18 = vsel %vm25_vm0, %v261_v17, 0  ;;  %v157_v20 = vsel %vm25_vm0, %v262_v19, 0  ;;  %v263_v21 = vld [vmem:[%s376_s3 + $0x30] sm:$0xff]   ;;  %v264_v23 = vld [vmem:[%s376_s3 + $0x38] sm:$0xff]  }
   0x5   :  { %37 = vadd.xlane.f32.xlu1 %v36_v7  ;;  %237 = vmatprep.subr.bf16.mxu0 %v273_v2  ;;  %v160_v22 = vsel %vm25_vm0, %v263_v21, 0  ;;  %v163_v24 = vsel %vm25_vm0, %v264_v23, 0  ;;  %v214_v44 = vld [vmem:[%s377_s1] ss:$0 sm:$0xff] }
   0x6   :  { %v215_v49 = vld [vmem:[%s378_s2] ss:$0 sm:$0xff] }
   0x7   :  { %30 = vadd.xlane.f32.xlu0 %v29_v8  ;;  %v216_v54 = vld [vmem:[%s379_s4] ss:$0 sm:$0xff] }
   0x9   :  { %40 = vadd.xlane.f32.xlu1 %v39_v10 }
   0xc   :  { %238 = vmatpush3.bf16.xpose.msra.mxu0 %v145_v12 }
   0xd   :  { %239 = vmatprep.subr.bf16.mxu0 %v273_v2 }
  0x14   :  { %240 = vmatpush3.bf16.xpose.msra.mxu0 %v148_v14 }
  0x15   :  { %241 = vmatprep.subr.bf16.mxu0 %v273_v2 }
  0x1c   :  { %242 = vmatpush3.bf16.xpose.msra.mxu0 %v151_v16 }
  0x1d   :  { %243 = vmatprep.subr.bf16.mxu0 %v273_v2 }
  0x24   :  { %244 = vmatpush3.bf16.xpose.msra.mxu0 %v154_v18 }
  0x25   :  { %245 = vmatprep.subr.bf16.mxu0 %v273_v2 }
  0x2c   :  { %246 = vmatpush3.bf16.xpose.msra.mxu0 %v157_v20 }
  0x2d   :  { %247 = vmatprep.subr.bf16.mxu0 %v273_v2 }
  0x34   :  { %248 = vmatpush3.bf16.xpose.msra.mxu0 %v160_v22 }
  0x35   :  { %249 = vmatprep.subr.bf16.mxu0 %v273_v2 }
  0x3c   :  { %250 = vmatpush3.bf16.xpose.msra.mxu0 %v163_v24 }
  0x90   :  { %v28_v25 = vpop.xlane.xlu0 %27 }
  0x91   :  { %v32_v26 = vmul.f32 0.03125, %v28_v25 }
  0x92   :  { %v38_v27 = vpop.xlane.xlu1 %37 }
  0x93   :  { %v44_v28 = vmul.f32 %v32_v26, %v32_v26  ;;  %v42_v29 = vmul.f32 0.03125, %v38_v27  ;;  %v50_v41 = vsub.f32 %v308_v0, %v32_v26 }
  0x94   :  { %v31_v30 = vpop.xlane.xlu0 %30 }
  0x95   :  { %v46_v31 = vsub.f32 %v42_v29, %v44_v28  ;;  %v33_v32 = vmul.f32 0.03125, %v31_v30 }
  0x96   :  { %v41_v33 = vpop.xlane.xlu1 %40 }
  0x97   :  { %v48_v34 = vmax.f32 %v46_v31, 0.0  ;;  %v45_v35 = vmul.f32 %v33_v32, %v33_v32  ;;  %v43_v36 = vmul.f32 0.03125, %v41_v33  ;;  %v51_v45 = vsub.f32 %v313_v1, %v33_v32 }
  0x99   :  { %v52_v37 = vadd.f32 1e-05, %v48_v34  ;;  %v47_v38 = vsub.f32 %v43_v36, %v45_v35 }
  0x9b   :  { %265 = vrsqrt.f32 %v52_v37  ;;  %v49_v39 = vmax.f32 %v47_v38, 0.0 }
  0x9d   :  { %v53_v40 = vadd.f32 1e-05, %v49_v39 }
  0x9f   :  { %267 = vrsqrt.f32 %v53_v40 }
  0xa5   :  { %v266_v42 = vpop.eup %265 }
  0xa6   :  { %v56_v43 = vmul.f32 %v266_v42, %v50_v41 }
  0xa8   :  { %v64_v48 = vmul.f32 %v214_v44, %v56_v43 }
  0xa9   :  { %v268_v46 = vpop.eup %267 }
  0xaa   :  { %v57_v47 = vmul.f32 %v268_v46, %v51_v45  ;;  %v72_v51 = vadd.f32 %v215_v49, %v64_v48 }
  0xac   :  { %v65_v50 = vmul.f32 %v214_v44, %v57_v47 }
  0xae   :  { %v73_v52 = vadd.f32 %v215_v49, %v65_v50 }
  0xb0   :  { %v74_v53 = vpack.c.bf16 %v73_v52, %v72_v51 }
  0xb2   :  { %252 = vmatmul.mubr.msk.bf16.vlgmr.msra.gmra.mrb[0].mxu0 %vm25_vm0, %v74_v53 }
 0x185   :  { %v199_v55 = vpop.f32.mrb[0].mxu0 }
 0x186   :  { %v200_v56 = vadd.f32 %v216_v54, %v199_v55  ;;  %v253_v57 = vpop.f32.mrb[1].mxu0 }
 0x187   :  { %v202_v58 = vpop.f32.mrb[2].mxu0 }
 0x188   :  { %269 = vtanh.f32 %v200_v56  ;;  %v203_v59 = vadd.f32 %v216_v54, %v202_v58  ;;  %v254_v60 = vpop.f32.mrb[3].mxu0 }
 0x18a   :  { %271 = vtanh.f32 %v203_v59 }
 0x192   :  { %v270_v61 = vpop.eup %269 }
 0x193   :  { %208 = vst [vmem:[%s380_s5] sm:$0xff] %v270_v61 }
 0x194   :  { %v272_v62 = vpop.eup %271 }
 0x195   :  { %209 = vst [vmem:[%s380_s5 + $0x8] sm:$0xff] %v272_v62 }

</bundles_post_ra>
